<compile_context>
chip_gen: v7x
topology: tpu7x:2x2x1
jax: 0.10.0
libtpu: 0.0.40
codegen_flags: <defaults>
</compile_context>

<pallas_src>
import functools

import jax
import jax.numpy as jnp
from jax.experimental import pallas as pl
from jax.experimental.pallas import tpu as pltpu


# ----------------------------------------------------------------------------
# Fused Pallas kernel (one grid step per batch element)
# ----------------------------------------------------------------------------
def _fused_disc_kernel(p1_ref, w1_ref, b1_ref, w2_ref, b2_ref, w3_ref, b3_ref,
                       out_ref, *, oh1, ow1, slope):
    """p1_ref : (1, oh1*ow1, 16*C_in)  conv1 im2col patches (parity-grouped rows)
    w1_ref : (16*C_in, C1)   b1_ref : (1, C1)
    w2_ref : (16*C1, C2)     b2_ref : (1, C2)   (rows ordered (p,q,a,b,c))
    w3_ref : (16*C2, C3)     b3_ref : (1, C3)   (C3 = 1 + num_classes, merged head)
    out_ref: (1, oh3*ow3, C3)
    """
    f32 = jnp.float32
    c1 = w1_ref.shape[-1]
    c2 = w2_ref.shape[-1]
    oh2, ow2 = oh1 // 2, ow1 // 2
    oh3, ow3 = oh2 - 1, ow2 - 1
    gsz = oh2 * ow2  # rows per parity group of the conv1 output

    def leaky(v):
        return jnp.where(v > 0, v, slope * v)

    # ---- layer 1: single im2col matmul (patches built in the wrapper) -------
    y1 = jnp.dot(p1_ref[0].astype(w1_ref.dtype), w1_ref[...],
                 preferred_element_type=f32)
    y1 = leaky(y1 + b1_ref[...])          # (oh1*ow1, c1), rows parity-grouped

    def grid_row_slice(src, row_base, n_rows, n_cols, rr, cc0, out_w, ch):
        """`src` holds an (n_rows, n_cols, ch) grid flattened row-major starting
        at row `row_base`.  Return grid[rr, cc0:cc0+out_w, :] with zeros for
        out-of-range rows / columns.  All indices are static Python ints."""
        if rr < 0 or rr >= n_rows:
            return jnp.zeros((out_w, ch), f32)
        lo, hi = max(cc0, 0), min(cc0 + out_w, n_cols)
        start = row_base + rr * n_cols
        seg = src[start + lo:start + hi, :]
        parts = []
        if lo > cc0:
            parts.append(jnp.zeros((lo - cc0, ch), f32))
        parts.append(seg)
        if cc0 + out_w > hi:
            parts.append(jnp.zeros((cc0 + out_w - hi, ch), f32))
        return jnp.concatenate(parts, axis=0) if len(parts) > 1 else seg

    # ---- layer 2: k=4 / s=2 / p=1 conv as ONE (M, 16*c1) x (16*c1, c2) dot ---
    # The stride-2 conv over the zero-padded conv1 output equals a sum of four
    # k=2/s=1 convs over its parity planes; conv1's rows are already grouped by
    # output parity (ee, eo, oe, oo), so every patch piece is a row slice of y1.
    rows2 = []
    for i in range(oh2):
        pieces = []
        for p in (0, 1):
            for q in (0, 1):
                g = 2 * (1 - p) + (1 - q)              # which parity group of y1
                for a in (0, 1):
                    for b in (0, 1):
                        pieces.append(grid_row_slice(
                            y1, g * gsz, oh2, ow2,
                            i + a + p - 1, b + q - 1, ow2, c1))
        rows2.append(jnp.concatenate(pieces, axis=-1))   # (ow2, 16*c1)
    patch2 = jnp.concatenate(rows2, axis=0)              # (oh2*ow2, 16*c1)
    y2 = jnp.dot(patch2.astype(w2_ref.dtype), w2_ref[...],
                 preferred_element_type=f32)
    y2 = leaky(y2 + b2_ref[...])                         # feature_map, row-major

    # ---- layer 3: merged clf + cond conv (k=4 / s=1 / p=1), ONE matmul ------
    rows3 = []
    for i in range(oh3):
        pieces = []
        for kh in range(4):
            for kw in range(4):
                pieces.append(grid_row_slice(
                    y2, 0, oh2, ow2, i + kh - 1, kw - 1, ow3, c2))
        rows3.append(jnp.concatenate(pieces, axis=-1))   # (ow3, 16*c2)
    patch3 = jnp.concatenate(rows3, axis=0)              # (oh3*ow3, 16*c2)
    y3 = jnp.dot(patch3.astype(w3_ref.dtype), w3_ref[...],
                 preferred_element_type=f32) + b3_ref[...]
    out_ref[0] = y3.astype(out_ref.dtype)                # single store per image


# ----------------------------------------------------------------------------
# Wrapper glue (plain JAX): patch building for the input layer
# ----------------------------------------------------------------------------
def _build_conv1_patches(x_nhwc):
    """im2col for conv1 (k=4, s=2, p=1); rows grouped by output-parity
    (ee, eo, oe, oo) so the fused kernel can express conv2 as row slices."""
    n, h, w, cin = x_nhwc.shape
    assert h % 4 == 0 and w % 4 == 0 and h >= 8 and w >= 8
    oh1, ow1 = h // 2, w // 2
    xpad = jnp.pad(x_nhwc, ((0, 0), (1, 1), (1, 1), (0, 0)))
    taps = [xpad[:, kh:kh + 2 * oh1 - 1:2, kw:kw + 2 * ow1 - 1:2, :]
            for kh in range(4) for kw in range(4)]        # each (n, oh1, ow1, cin)
    pat = jnp.stack(taps, axis=3).reshape(n, oh1, ow1, 16 * cin)
    gh, gw = oh1 // 2, ow1 // 2
    groups = [pat[:, ip::2, jp::2, :].reshape(n, gh * gw, 16 * cin)
              for ip in (0, 1) for jp in (0, 1)]
    return jnp.concatenate(groups, axis=1)                # (n, oh1*ow1, 16*cin)


# ----------------------------------------------------------------------------
# DiscriminatorBase (Pallas)
# ----------------------------------------------------------------------------
class PallasDiscriminator:
    def __init__(self, in_channels, num_classes=None, latent_dim=8, *, key,
                 compute_dtype=jnp.float32):
        self.in_channels = in_channels
        self.num_classes = num_classes
        out_channels = latent_dim * 2
        ks = jax.random.split(key, 8)

        def winit(k, shape):
            fan_in = shape[0] * shape[1] * shape[2]
            return jax.random.normal(k, shape, jnp.float32) / jnp.sqrt(float(fan_in))

        def binit(k, c):
            return 0.05 * jax.random.normal(k, (1, c), jnp.float32)

        # HWIO weights (kept for the pure-JAX reference)
        self.w1 = winit(ks[0], (4, 4, in_channels, latent_dim))
        self.b1 = binit(ks[1], latent_dim)
        self.w2 = winit(ks[2], (4, 4, latent_dim, out_channels))
        self.b2 = binit(ks[3], out_channels)
        self.w_clf = winit(ks[4], (4, 4, out_channels, 1))
        self.b_clf = binit(ks[5], 1)
        if num_classes is None:
            self.w_cond = None
            self.b_cond = None
        else:
            self.w_cond = winit(ks[6], (4, 4, out_channels, num_classes))
            self.b_cond = binit(ks[7], num_classes)

        # Pre-flattened weights for the fused kernel.
        self.compute_dtype = compute_dtype
        self.w1_flat = self.w1.reshape(16 * in_channels, latent_dim).astype(compute_dtype)
        order = [(p, q, a, b) for p in (0, 1) for q in (0, 1)
                 for a in (0, 1) for b in (0, 1)]
        self.w2_flat = jnp.concatenate(
            [self.w2[2 * a + p, 2 * b + q] for (p, q, a, b) in order],
            axis=0).astype(compute_dtype)                 # (16*latent_dim, 2*latent_dim)
        if num_classes is None:
            w3 = self.w_clf
            self.b3_flat = self.b_clf
        else:
            w3 = jnp.concatenate([self.w_clf, self.w_cond], axis=-1)   # merged head
            self.b3_flat = jnp.concatenate([self.b_clf, self.b_cond], axis=-1)
        self.w3_flat = w3.reshape(16 * out_channels, -1).astype(compute_dtype)

    # ---- fused Pallas forward (mirrors DiscriminatorBase.forward) ----
    def __call__(self, x_nchw):
        n, _, h, w = x_nchw.shape
        x = jnp.transpose(x_nchw, (0, 2, 3, 1))           # NCHW -> NHWC
        patch1 = _build_conv1_patches(x).astype(self.compute_dtype)
        oh1, ow1 = h // 2, w // 2
        oh2, ow2 = oh1 // 2, ow1 // 2
        oh3, ow3 = oh2 - 1, ow2 - 1
        c3 = self.w3_flat.shape[-1]

        kernel = functools.partial(_fused_disc_kernel, oh1=oh1, ow1=ow1, slope=0.2)
        out = pl.pallas_call(
            kernel,
            out_shape=jax.ShapeDtypeStruct((n, oh3 * ow3, c3), jnp.float32),
            grid=(n,),
            in_specs=[
                pl.BlockSpec((1, oh1 * ow1, patch1.shape[-1]), lambda i: (i, 0, 0)),
                pl.BlockSpec(self.w1_flat.shape, lambda i: (0, 0)),
                pl.BlockSpec(self.b1.shape, lambda i: (0, 0)),
                pl.BlockSpec(self.w2_flat.shape, lambda i: (0, 0)),
                pl.BlockSpec(self.b2.shape, lambda i: (0, 0)),
                pl.BlockSpec(self.w3_flat.shape, lambda i: (0, 0)),
                pl.BlockSpec(self.b3_flat.shape, lambda i: (0, 0)),
            ],
            out_specs=pl.BlockSpec((1, oh3 * ow3, c3), lambda i: (i, 0, 0)),
            compiler_params=pltpu.CompilerParams(
                dimension_semantics=("parallel",)),
        )(patch1, self.w1_flat, self.b1, self.w2_flat, self.b2,
          self.w3_flat, self.b3_flat)

        logits = out[:, :, 0].reshape(n, oh3, ow3)[:, None, :, :]   # NCHW like torch
        cond_logits = None
        if self.num_classes is not None:
            cond_logits = jnp.mean(out[:, :, 1:], axis=1)           # (N, num_classes)
        return logits, cond_logits

    # ---- pure-JAX reference (correctness check only) ----
    def reference(self, x_nchw):
        def conv(x, w, b, stride):
            y = jax.lax.conv_general_dilated(
                x, w, window_strides=(stride, stride),
                padding=[(1, 1), (1, 1)],
                dimension_numbers=("NHWC", "HWIO", "NHWC"))
            return y + b.reshape(1, 1, 1, -1)

        x = jnp.transpose(x_nchw, (0, 2, 3, 1))
        h = conv(x, self.w1, self.b1, 2)
        h = jnp.where(h > 0, h, 0.2 * h)
        fm = conv(h, self.w2, self.b2, 2)
        fm = jnp.where(fm > 0, fm, 0.2 * fm)
        logits = jnp.transpose(conv(fm, self.w_clf, self.b_clf, 1), (0, 3, 1, 2))
        cond = None
        if self.num_classes is not None:
            cond = jnp.mean(conv(fm, self.w_cond, self.b_cond, 1), axis=(1, 2))
        return logits, cond


if __name__ == "__main__":
    key = jax.random.PRNGKey(0)
    k_x, k_p = jax.random.split(key)

    # torch-style NCHW input: batch=2, in_channels=4, spatial=16
    x = jax.random.normal(k_x, (2, 4, 16, 16), jnp.float32)

    model = PallasDiscriminator(in_channels=4, num_classes=5, latent_dim=8, key=k_p)

    fwd = jax.jit(model.__call__)
    logits, cond_logits = fwd(x)
    jax.block_until_ready((logits, cond_logits))

    ref_logits, ref_cond = model.reference(x)
    assert logits.shape == (2, 1, 3, 3), logits.shape
    assert cond_logits.shape == (2, 5), cond_logits.shape
    assert jnp.allclose(logits, ref_logits, atol=1e-4, rtol=1e-3)
    assert jnp.allclose(cond_logits, ref_cond, atol=1e-4, rtol=1e-3)

    print("KERNEL_OK")
</pallas_src>

<mosaic_0001>
module attributes {stable_mosaic.version = 11 : i64} {
  func.func @_fused_disc_kernel(%arg0: i32, %arg1: memref<1x64x64xf32, #tpu.memory_space<vmem>>, %arg2: memref<64x8xf32, #tpu.memory_space<vmem>>, %arg3: memref<1x8xf32, #tpu.memory_space<vmem>>, %arg4: memref<128x16xf32, #tpu.memory_space<vmem>>, %arg5: memref<1x16xf32, #tpu.memory_space<vmem>>, %arg6: memref<256x6xf32, #tpu.memory_space<vmem>>, %arg7: memref<1x6xf32, #tpu.memory_space<vmem>>, %arg8: memref<1x9x6xf32, #tpu.memory_space<vmem>>) attributes {dimension_semantics = [#tpu.dimension_semantics<parallel>], iteration_bounds = array<i64: 2>, scalar_prefetch = 0 : i64, scratch_operands = 0 : i64, tpu.core_type = #tpu.core_type<tc>, window_params = [{transform_indices = @transform_0, window_bounds = array<i64: 1, 64, 64>}, {pipeline_mode = #tpu.pipeline_mode<synchronous>, transform_indices = @transform_1, window_bounds = array<i64: 64, 8>}, {pipeline_mode = #tpu.pipeline_mode<synchronous>, transform_indices = @transform_2, window_bounds = array<i64: 1, 8>}, {pipeline_mode = #tpu.pipeline_mode<synchronous>, transform_indices = @transform_3, window_bounds = array<i64: 128, 16>}, {pipeline_mode = #tpu.pipeline_mode<synchronous>, transform_indices = @transform_4, window_bounds = array<i64: 1, 16>}, {pipeline_mode = #tpu.pipeline_mode<synchronous>, transform_indices = @transform_5, window_bounds = array<i64: 256, 6>}, {pipeline_mode = #tpu.pipeline_mode<synchronous>, transform_indices = @transform_6, window_bounds = array<i64: 1, 6>}, {transform_indices = @transform_7, window_bounds = array<i64: 1, 9, 6>}]} {
    %c0 = arith.constant 0 : index
    %c0_0 = arith.constant 0 : index
    %c0_1 = arith.constant 0 : index
    %0 = vector.load %arg1[%c0, %c0_0, %c0_1] : memref<1x64x64xf32, #tpu.memory_space<vmem>>, vector<1x64x64xf32>
    %1 = vector.shape_cast %0 : vector<1x64x64xf32> to vector<64x64xf32>
    %c0_2 = arith.constant 0 : index
    %c0_3 = arith.constant 0 : index
    %2 = vector.load %arg2[%c0_2, %c0_3] : memref<64x8xf32, #tpu.memory_space<vmem>>, vector<64x8xf32>
    %cst = arith.constant dense<0.000000e+00> : vector<64x8xf32>
    %3 = tpu.matmul %1, %2, %cst {dimension_numbers = #tpu.dot_dimension_numbers<[1], [0], [0], [1], [0, 0, 1, 1], [], []>} : vector<64x64xf32>, vector<64x8xf32>, vector<64x8xf32> -> vector<64x8xf32>
    %c0_4 = arith.constant 0 : index
    %c0_5 = arith.constant 0 : index
    %4 = vector.load %arg3[%c0_4, %c0_5] : memref<1x8xf32, #tpu.memory_space<vmem>>, vector<1x8xf32>
    %5 = vector.broadcast %4 : vector<1x8xf32> to vector<64x8xf32>
    %6 = arith.addf %3, %5 : vector<64x8xf32>
    %cst_6 = arith.constant 0.000000e+00 : f32
    %7 = vector.broadcast %cst_6 : f32 to vector<64x8xf32>
    %8 = arith.cmpf ogt, %6, %7 : vector<64x8xf32>
    %cst_7 = arith.constant 2.000000e-01 : f32
    %9 = vector.broadcast %cst_7 : f32 to vector<64x8xf32>
    %10 = arith.mulf %9, %6 : vector<64x8xf32>
    %11 = arith.select %8, %6, %10 : vector<64x8xi1>, vector<64x8xf32>
    %cst_8 = arith.constant 0.000000e+00 : f32
    %12 = vector.broadcast %cst_8 : f32 to vector<4x8xf32>
    %cst_9 = arith.constant 0.000000e+00 : f32
    %13 = vector.broadcast %cst_9 : f32 to vector<4x8xf32>
    %14 = vector.extract_strided_slice %11 {offsets = [48, 0], sizes = [3, 8], strides = [1, 1]} : vector<64x8xf32> to vector<3x8xf32>
    %cst_10 = arith.constant 0.000000e+00 : f32
    %15 = vector.broadcast %cst_10 : f32 to vector<1x8xf32>
    %16 = tpu.concatenate %15, %14 in 0 : vector<1x8xf32>, vector<3x8xf32> -> vector<4x8xf32>
    %17 = vector.extract_strided_slice %11 {offsets = [48, 0], sizes = [4, 8], strides = [1, 1]} : vector<64x8xf32> to vector<4x8xf32>
    %cst_11 = arith.constant 0.000000e+00 : f32
    %18 = vector.broadcast %cst_11 : f32 to vector<4x8xf32>
    %cst_12 = arith.constant 0.000000e+00 : f32
    %19 = vector.broadcast %cst_12 : f32 to vector<4x8xf32>
    %20 = vector.extract_strided_slice %11 {offsets = [32, 0], sizes = [4, 8], strides = [1, 1]} : vector<64x8xf32> to vector<4x8xf32>
    %21 = vector.extract_strided_slice %11 {offsets = [33, 0], sizes = [3, 8], strides = [1, 1]} : vector<64x8xf32> to vector<3x8xf32>
    %cst_13 = arith.constant 0.000000e+00 : f32
    %22 = vector.broadcast %cst_13 : f32 to vector<1x8xf32>
    %23 = tpu.concatenate %21, %22 in 0 : vector<3x8xf32>, vector<1x8xf32> -> vector<4x8xf32>
    %24 = vector.extract_strided_slice %11 {offsets = [16, 0], sizes = [3, 8], strides = [1, 1]} : vector<64x8xf32> to vector<3x8xf32>
    %cst_14 = arith.constant 0.000000e+00 : f32
    %25 = vector.broadcast %cst_14 : f32 to vector<1x8xf32>
    %26 = tpu.concatenate %25, %24 in 0 : vector<1x8xf32>, vector<3x8xf32> -> vector<4x8xf32>
    %27 = vector.extract_strided_slice %11 {offsets = [16, 0], sizes = [4, 8], strides = [1, 1]} : vector<64x8xf32> to vector<4x8xf32>
    %28 = vector.extract_strided_slice %11 {offsets = [20, 0], sizes = [3, 8], strides = [1, 1]} : vector<64x8xf32> to vector<3x8xf32>
    %cst_15 = arith.constant 0.000000e+00 : f32
    %29 = vector.broadcast %cst_15 : f32 to vector<1x8xf32>
    %30 = tpu.concatenate %29, %28 in 0 : vector<1x8xf32>, vector<3x8xf32> -> vector<4x8xf32>
    %31 = vector.extract_strided_slice %11 {offsets = [20, 0], sizes = [4, 8], strides = [1, 1]} : vector<64x8xf32> to vector<4x8xf32>
    %32 = vector.extract_strided_slice %11 {offsets = [0, 0], sizes = [4, 8], strides = [1, 1]} : vector<64x8xf32> to vector<4x8xf32>
    %33 = vector.extract_strided_slice %11 {offsets = [1, 0], sizes = [3, 8], strides = [1, 1]} : vector<64x8xf32> to vector<3x8xf32>
    %cst_16 = arith.constant 0.000000e+00 : f32
    %34 = vector.broadcast %cst_16 : f32 to vector<1x8xf32>
    %35 = tpu.concatenate %33, %34 in 0 : vector<3x8xf32>, vector<1x8xf32> -> vector<4x8xf32>
    %36 = vector.extract_strided_slice %11 {offsets = [4, 0], sizes = [4, 8], strides = [1, 1]} : vector<64x8xf32> to vector<4x8xf32>
    %37 = vector.extract_strided_slice %11 {offsets = [5, 0], sizes = [3, 8], strides = [1, 1]} : vector<64x8xf32> to vector<3x8xf32>
    %cst_17 = arith.constant 0.000000e+00 : f32
    %38 = vector.broadcast %cst_17 : f32 to vector<1x8xf32>
    %39 = tpu.concatenate %37, %38 in 0 : vector<3x8xf32>, vector<1x8xf32> -> vector<4x8xf32>
    %40 = tpu.concatenate %12, %13, %16, %17, %18, %19, %20, %23, %26, %27, %30, %31, %32, %35, %36, %39 in 1 : vector<4x8xf32>, vector<4x8xf32>, vector<4x8xf32>, vector<4x8xf32>, vector<4x8xf32>, vector<4x8xf32>, vector<4x8xf32>, vector<4x8xf32>, vector<4x8xf32>, vector<4x8xf32>, vector<4x8xf32>, vector<4x8xf32>, vector<4x8xf32>, vector<4x8xf32>, vector<4x8xf32>, vector<4x8xf32> -> vector<4x128xf32>
    %41 = vector.extract_strided_slice %11 {offsets = [48, 0], sizes = [3, 8], strides = [1, 1]} : vector<64x8xf32> to vector<3x8xf32>
    %cst_18 = arith.constant 0.000000e+00 : f32
    %42 = vector.broadcast %cst_18 : f32 to vector<1x8xf32>
    %43 = tpu.concatenate %42, %41 in 0 : vector<1x8xf32>, vector<3x8xf32> -> vector<4x8xf32>
    %44 = vector.extract_strided_slice %11 {offsets = [48, 0], sizes = [4, 8], strides = [1, 1]} : vector<64x8xf32> to vector<4x8xf32>
    %45 = vector.extract_strided_slice %11 {offsets = [52, 0], sizes = [3, 8], strides = [1, 1]} : vector<64x8xf32> to vector<3x8xf32>
    %cst_19 = arith.constant 0.000000e+00 : f32
    %46 = vector.broadcast %cst_19 : f32 to vector<1x8xf32>
    %47 = tpu.concatenate %46, %45 in 0 : vector<1x8xf32>, vector<3x8xf32> -> vector<4x8xf32>
    %48 = vector.extract_strided_slice %11 {offsets = [52, 0], sizes = [4, 8], strides = [1, 1]} : vector<64x8xf32> to vector<4x8xf32>
    %49 = vector.extract_strided_slice %11 {offsets = [32, 0], sizes = [4, 8], strides = [1, 1]} : vector<64x8xf32> to vector<4x8xf32>
    %50 = vector.extract_strided_slice %11 {offsets = [33, 0], sizes = [3, 8], strides = [1, 1]} : vector<64x8xf32> to vector<3x8xf32>
    %cst_20 = arith.constant 0.000000e+00 : f32
    %51 = vector.broadcast %cst_20 : f32 to vector<1x8xf32>
    %52 = tpu.concatenate %50, %51 in 0 : vector<3x8xf32>, vector<1x8xf32> -> vector<4x8xf32>
    %53 = vector.extract_strided_slice %11 {offsets = [36, 0], sizes = [4, 8], strides = [1, 1]} : vector<64x8xf32> to vector<4x8xf32>
    %54 = vector.extract_strided_slice %11 {offsets = [37, 0], sizes = [3, 8], strides = [1, 1]} : vector<64x8xf32> to vector<3x8xf32>
    %cst_21 = arith.constant 0.000000e+00 : f32
    %55 = vector.broadcast %cst_21 : f32 to vector<1x8xf32>
    %56 = tpu.concatenate %54, %55 in 0 : vector<3x8xf32>, vector<1x8xf32> -> vector<4x8xf32>
    %57 = vector.extract_strided_slice %11 {offsets = [20, 0], sizes = [3, 8], strides = [1, 1]} : vector<64x8xf32> to vector<3x8xf32>
    %cst_22 = arith.constant 0.000000e+00 : f32
    %58 = vector.broadcast %cst_22 : f32 to vector<1x8xf32>
    %59 = tpu.concatenate %58, %57 in 0 : vector<1x8xf32>, vector<3x8xf32> -> vector<4x8xf32>
    %60 = vector.extract_strided_slice %11 {offsets = [20, 0], sizes = [4, 8], strides = [1, 1]} : vector<64x8xf32> to vector<4x8xf32>
    %61 = vector.extract_strided_slice %11 {offsets = [24, 0], sizes = [3, 8], strides = [1, 1]} : vector<64x8xf32> to vector<3x8xf32>
    %cst_23 = arith.constant 0.000000e+00 : f32
    %62 = vector.broadcast %cst_23 : f32 to vector<1x8xf32>
    %63 = tpu.concatenate %62, %61 in 0 : vector<1x8xf32>, vector<3x8xf32> -> vector<4x8xf32>
    %64 = vector.extract_strided_slice %11 {offsets = [24, 0], sizes = [4, 8], strides = [1, 1]} : vector<64x8xf32> to vector<4x8xf32>
    %65 = vector.extract_strided_slice %11 {offsets = [4, 0], sizes = [4, 8], strides = [1, 1]} : vector<64x8xf32> to vector<4x8xf32>
    %66 = vector.extract_strided_slice %11 {offsets = [5, 0], sizes = [3, 8], strides = [1, 1]} : vector<64x8xf32> to vector<3x8xf32>
    %cst_24 = arith.constant 0.000000e+00 : f32
    %67 = vector.broadcast %cst_24 : f32 to vector<1x8xf32>
    %68 = tpu.concatenate %66, %67 in 0 : vector<3x8xf32>, vector<1x8xf32> -> vector<4x8xf32>
    %69 = vector.extract_strided_slice %11 {offsets = [8, 0], sizes = [4, 8], strides = [1, 1]} : vector<64x8xf32> to vector<4x8xf32>
    %70 = vector.extract_strided_slice %11 {offsets = [9, 0], sizes = [3, 8], strides = [1, 1]} : vector<64x8xf32> to vector<3x8xf32>
    %cst_25 = arith.constant 0.000000e+00 : f32
    %71 = vector.broadcast %cst_25 : f32 to vector<1x8xf32>
    %72 = tpu.concatenate %70, %71 in 0 : vector<3x8xf32>, vector<1x8xf32> -> vector<4x8xf32>
    %73 = tpu.concatenate %43, %44, %47, %48, %49, %52, %53, %56, %59, %60, %63, %64, %65, %68, %69, %72 in 1 : vector<4x8xf32>, vector<4x8xf32>, vector<4x8xf32>, vector<4x8xf32>, vector<4x8xf32>, vector<4x8xf32>, vector<4x8xf32>, vector<4x8xf32>, vector<4x8xf32>, vector<4x8xf32>, vector<4x8xf32>, vector<4x8xf32>, vector<4x8xf32>, vector<4x8xf32>, vector<4x8xf32>, vector<4x8xf32> -> vector<4x128xf32>
    %74 = vector.extract_strided_slice %11 {offsets = [52, 0], sizes = [3, 8], strides = [1, 1]} : vector<64x8xf32> to vector<3x8xf32>
    %cst_26 = arith.constant 0.000000e+00 : f32
    %75 = vector.broadcast %cst_26 : f32 to vector<1x8xf32>
    %76 = tpu.concatenate %75, %74 in 0 : vector<1x8xf32>, vector<3x8xf32> -> vector<4x8xf32>
    %77 = vector.extract_strided_slice %11 {offsets = [52, 0], sizes = [4, 8], strides = [1, 1]} : vector<64x8xf32> to vector<4x8xf32>
    %78 = vector.extract_strided_slice %11 {offsets = [56, 0], sizes = [3, 8], strides = [1, 1]} : vector<64x8xf32> to vector<3x8xf32>
    %cst_27 = arith.constant 0.000000e+00 : f32
    %79 = vector.broadcast %cst_27 : f32 to vector<1x8xf32>
    %80 = tpu.concatenate %79, %78 in 0 : vector<1x8xf32>, vector<3x8xf32> -> vector<4x8xf32>
    %81 = vector.extract_strided_slice %11 {offsets = [56, 0], sizes = [4, 8], strides = [1, 1]} : vector<64x8xf32> to vector<4x8xf32>
    %82 = vector.extract_strided_slice %11 {offsets = [36, 0], sizes = [4, 8], strides = [1, 1]} : vector<64x8xf32> to vector<4x8xf32>
    %83 = vector.extract_strided_slice %11 {offsets = [37, 0], sizes = [3, 8], strides = [1, 1]} : vector<64x8xf32> to vector<3x8xf32>
    %cst_28 = arith.constant 0.000000e+00 : f32
    %84 = vector.broadcast %cst_28 : f32 to vector<1x8xf32>
    %85 = tpu.concatenate %83, %84 in 0 : vector<3x8xf32>, vector<1x8xf32> -> vector<4x8xf32>
    %86 = vector.extract_strided_slice %11 {offsets = [40, 0], sizes = [4, 8], strides = [1, 1]} : vector<64x8xf32> to vector<4x8xf32>
    %87 = vector.extract_strided_slice %11 {offsets = [41, 0], sizes = [3, 8], strides = [1, 1]} : vector<64x8xf32> to vector<3x8xf32>
    %cst_29 = arith.constant 0.000000e+00 : f32
    %88 = vector.broadcast %cst_29 : f32 to vector<1x8xf32>
    %89 = tpu.concatenate %87, %88 in 0 : vector<3x8xf32>, vector<1x8xf32> -> vector<4x8xf32>
    %90 = vector.extract_strided_slice %11 {offsets = [24, 0], sizes = [3, 8], strides = [1, 1]} : vector<64x8xf32> to vector<3x8xf32>
    %cst_30 = arith.constant 0.000000e+00 : f32
    %91 = vector.broadcast %cst_30 : f32 to vector<1x8xf32>
    %92 = tpu.concatenate %91, %90 in 0 : vector<1x8xf32>, vector<3x8xf32> -> vector<4x8xf32>
    %93 = vector.extract_strided_slice %11 {offsets = [24, 0], sizes = [4, 8], strides = [1, 1]} : vector<64x8xf32> to vector<4x8xf32>
    %94 = vector.extract_strided_slice %11 {offsets = [28, 0], sizes = [3, 8], strides = [1, 1]} : vector<64x8xf32> to vector<3x8xf32>
    %cst_31 = arith.constant 0.000000e+00 : f32
    %95 = vector.broadcast %cst_31 : f32 to vector<1x8xf32>
    %96 = tpu.concatenate %95, %94 in 0 : vector<1x8xf32>, vector<3x8xf32> -> vector<4x8xf32>
    %97 = vector.extract_strided_slice %11 {offsets = [28, 0], sizes = [4, 8], strides = [1, 1]} : vector<64x8xf32> to vector<4x8xf32>
    %98 = vector.extract_strided_slice %11 {offsets = [8, 0], sizes = [4, 8], strides = [1, 1]} : vector<64x8xf32> to vector<4x8xf32>
    %99 = vector.extract_strided_slice %11 {offsets = [9, 0], sizes = [3, 8], strides = [1, 1]} : vector<64x8xf32> to vector<3x8xf32>
    %cst_32 = arith.constant 0.000000e+00 : f32
    %100 = vector.broadcast %cst_32 : f32 to vector<1x8xf32>
    %101 = tpu.concatenate %99, %100 in 0 : vector<3x8xf32>, vector<1x8xf32> -> vector<4x8xf32>
    %102 = vector.extract_strided_slice %11 {offsets = [12, 0], sizes = [4, 8], strides = [1, 1]} : vector<64x8xf32> to vector<4x8xf32>
    %103 = vector.extract_strided_slice %11 {offsets = [13, 0], sizes = [3, 8], strides = [1, 1]} : vector<64x8xf32> to vector<3x8xf32>
    %cst_33 = arith.constant 0.000000e+00 : f32
    %104 = vector.broadcast %cst_33 : f32 to vector<1x8xf32>
    %105 = tpu.concatenate %103, %104 in 0 : vector<3x8xf32>, vector<1x8xf32> -> vector<4x8xf32>
    %106 = tpu.concatenate %76, %77, %80, %81, %82, %85, %86, %89, %92, %93, %96, %97, %98, %101, %102, %105 in 1 : vector<4x8xf32>, vector<4x8xf32>, vector<4x8xf32>, vector<4x8xf32>, vector<4x8xf32>, vector<4x8xf32>, vector<4x8xf32>, vector<4x8xf32>, vector<4x8xf32>, vector<4x8xf32>, vector<4x8xf32>, vector<4x8xf32>, vector<4x8xf32>, vector<4x8xf32>, vector<4x8xf32>, vector<4x8xf32> -> vector<4x128xf32>
    %107 = vector.extract_strided_slice %11 {offsets = [56, 0], sizes = [3, 8], strides = [1, 1]} : vector<64x8xf32> to vector<3x8xf32>
    %cst_34 = arith.constant 0.000000e+00 : f32
    %108 = vector.broadcast %cst_34 : f32 to vector<1x8xf32>
    %109 = tpu.concatenate %108, %107 in 0 : vector<1x8xf32>, vector<3x8xf32> -> vector<4x8xf32>
    %110 = vector.extract_strided_slice %11 {offsets = [56, 0], sizes = [4, 8], strides = [1, 1]} : vector<64x8xf32> to vector<4x8xf32>
    %111 = vector.extract_strided_slice %11 {offsets = [60, 0], sizes = [3, 8], strides = [1, 1]} : vector<64x8xf32> to vector<3x8xf32>
    %cst_35 = arith.constant 0.000000e+00 : f32
    %112 = vector.broadcast %cst_35 : f32 to vector<1x8xf32>
    %113 = tpu.concatenate %112, %111 in 0 : vector<1x8xf32>, vector<3x8xf32> -> vector<4x8xf32>
    %114 = vector.extract_strided_slice %11 {offsets = [60, 0], sizes = [4, 8], strides = [1, 1]} : vector<64x8xf32> to vector<4x8xf32>
    %115 = vector.extract_strided_slice %11 {offsets = [40, 0], sizes = [4, 8], strides = [1, 1]} : vector<64x8xf32> to vector<4x8xf32>
    %116 = vector.extract_strided_slice %11 {offsets = [41, 0], sizes = [3, 8], strides = [1, 1]} : vector<64x8xf32> to vector<3x8xf32>
    %cst_36 = arith.constant 0.000000e+00 : f32
    %117 = vector.broadcast %cst_36 : f32 to vector<1x8xf32>
    %118 = tpu.concatenate %116, %117 in 0 : vector<3x8xf32>, vector<1x8xf32> -> vector<4x8xf32>
    %119 = vector.extract_strided_slice %11 {offsets = [44, 0], sizes = [4, 8], strides = [1, 1]} : vector<64x8xf32> to vector<4x8xf32>
    %120 = vector.extract_strided_slice %11 {offsets = [45, 0], sizes = [3, 8], strides = [1, 1]} : vector<64x8xf32> to vector<3x8xf32>
    %cst_37 = arith.constant 0.000000e+00 : f32
    %121 = vector.broadcast %cst_37 : f32 to vector<1x8xf32>
    %122 = tpu.concatenate %120, %121 in 0 : vector<3x8xf32>, vector<1x8xf32> -> vector<4x8xf32>
    %123 = vector.extract_strided_slice %11 {offsets = [28, 0], sizes = [3, 8], strides = [1, 1]} : vector<64x8xf32> to vector<3x8xf32>
    %cst_38 = arith.constant 0.000000e+00 : f32
    %124 = vector.broadcast %cst_38 : f32 to vector<1x8xf32>
    %125 = tpu.concatenate %124, %123 in 0 : vector<1x8xf32>, vector<3x8xf32> -> vector<4x8xf32>
    %126 = vector.extract_strided_slice %11 {offsets = [28, 0], sizes = [4, 8], strides = [1, 1]} : vector<64x8xf32> to vector<4x8xf32>
    %cst_39 = arith.constant 0.000000e+00 : f32
    %127 = vector.broadcast %cst_39 : f32 to vector<4x8xf32>
    %cst_40 = arith.constant 0.000000e+00 : f32
    %128 = vector.broadcast %cst_40 : f32 to vector<4x8xf32>
    %129 = vector.extract_strided_slice %11 {offsets = [12, 0], sizes = [4, 8], strides = [1, 1]} : vector<64x8xf32> to vector<4x8xf32>
    %130 = vector.extract_strided_slice %11 {offsets = [13, 0], sizes = [3, 8], strides = [1, 1]} : vector<64x8xf32> to vector<3x8xf32>
    %cst_41 = arith.constant 0.000000e+00 : f32
    %131 = vector.broadcast %cst_41 : f32 to vector<1x8xf32>
    %132 = tpu.concatenate %130, %131 in 0 : vector<3x8xf32>, vector<1x8xf32> -> vector<4x8xf32>
    %cst_42 = arith.constant 0.000000e+00 : f32
    %133 = vector.broadcast %cst_42 : f32 to vector<4x8xf32>
    %cst_43 = arith.constant 0.000000e+00 : f32
    %134 = vector.broadcast %cst_43 : f32 to vector<4x8xf32>
    %135 = tpu.concatenate %109, %110, %113, %114, %115, %118, %119, %122, %125, %126, %127, %128, %129, %132, %133, %134 in 1 : vector<4x8xf32>, vector<4x8xf32>, vector<4x8xf32>, vector<4x8xf32>, vector<4x8xf32>, vector<4x8xf32>, vector<4x8xf32>, vector<4x8xf32>, vector<4x8xf32>, vector<4x8xf32>, vector<4x8xf32>, vector<4x8xf32>, vector<4x8xf32>, vector<4x8xf32>, vector<4x8xf32>, vector<4x8xf32> -> vector<4x128xf32>
    %136 = tpu.concatenate %40, %73, %106, %135 in 0 : vector<4x128xf32>, vector<4x128xf32>, vector<4x128xf32>, vector<4x128xf32> -> vector<16x128xf32>
    %c0_44 = arith.constant 0 : index
    %c0_45 = arith.constant 0 : index
    %137 = vector.load %arg4[%c0_44, %c0_45] : memref<128x16xf32, #tpu.memory_space<vmem>>, vector<128x16xf32>
    %cst_46 = arith.constant dense<0.000000e+00> : vector<16x16xf32>
    %138 = tpu.matmul %136, %137, %cst_46 {dimension_numbers = #tpu.dot_dimension_numbers<[1], [0], [0], [1], [0, 0, 1, 1], [], []>} : vector<16x128xf32>, vector<128x16xf32>, vector<16x16xf32> -> vector<16x16xf32>
    %c0_47 = arith.constant 0 : index
    %c0_48 = arith.constant 0 : index
    %139 = vector.load %arg5[%c0_47, %c0_48] : memref<1x16xf32, #tpu.memory_space<vmem>>, vector<1x16xf32>
    %140 = vector.broadcast %139 : vector<1x16xf32> to vector<16x16xf32>
    %141 = arith.addf %138, %140 : vector<16x16xf32>
    %cst_49 = arith.constant 0.000000e+00 : f32
    %142 = vector.broadcast %cst_49 : f32 to vector<16x16xf32>
    %143 = arith.cmpf ogt, %141, %142 : vector<16x16xf32>
    %cst_50 = arith.constant 2.000000e-01 : f32
    %144 = vector.broadcast %cst_50 : f32 to vector<16x16xf32>
    %145 = arith.mulf %144, %141 : vector<16x16xf32>
    %146 = arith.select %143, %141, %145 : vector<16x16xi1>, vector<16x16xf32>
    %cst_51 = arith.constant 0.000000e+00 : f32
    %147 = vector.broadcast %cst_51 : f32 to vector<3x16xf32>
    %cst_52 = arith.constant 0.000000e+00 : f32
    %148 = vector.broadcast %cst_52 : f32 to vector<3x16xf32>
    %cst_53 = arith.constant 0.000000e+00 : f32
    %149 = vector.broadcast %cst_53 : f32 to vector<3x16xf32>
    %cst_54 = arith.constant 0.000000e+00 : f32
    %150 = vector.broadcast %cst_54 : f32 to vector<3x16xf32>
    %151 = vector.extract_strided_slice %146 {offsets = [0, 0], sizes = [2, 16], strides = [1, 1]} : vector<16x16xf32> to vector<2x16xf32>
    %cst_55 = arith.constant 0.000000e+00 : f32
    %152 = vector.broadcast %cst_55 : f32 to vector<1x16xf32>
    %153 = tpu.concatenate %152, %151 in 0 : vector<1x16xf32>, vector<2x16xf32> -> vector<3x16xf32>
    %154 = vector.extract_strided_slice %146 {offsets = [0, 0], sizes = [3, 16], strides = [1, 1]} : vector<16x16xf32> to vector<3x16xf32>
    %155 = vector.extract_strided_slice %146 {offsets = [1, 0], sizes = [3, 16], strides = [1, 1]} : vector<16x16xf32> to vector<3x16xf32>
    %156 = vector.extract_strided_slice %146 {offsets = [2, 0], sizes = [2, 16], strides = [1, 1]} : vector<16x16xf32> to vector<2x16xf32>
    %cst_56 = arith.constant 0.000000e+00 : f32
    %157 = vector.broadcast %cst_56 : f32 to vector<1x16xf32>
    %158 = tpu.concatenate %156, %157 in 0 : vector<2x16xf32>, vector<1x16xf32> -> vector<3x16xf32>
    %159 = vector.extract_strided_slice %146 {offsets = [4, 0], sizes = [2, 16], strides = [1, 1]} : vector<16x16xf32> to vector<2x16xf32>
    %cst_57 = arith.constant 0.000000e+00 : f32
    %160 = vector.broadcast %cst_57 : f32 to vector<1x16xf32>
    %161 = tpu.concatenate %160, %159 in 0 : vector<1x16xf32>, vector<2x16xf32> -> vector<3x16xf32>
    %162 = vector.extract_strided_slice %146 {offsets = [4, 0], sizes = [3, 16], strides = [1, 1]} : vector<16x16xf32> to vector<3x16xf32>
    %163 = vector.extract_strided_slice %146 {offsets = [5, 0], sizes = [3, 16], strides = [1, 1]} : vector<16x16xf32> to vector<3x16xf32>
    %164 = vector.extract_strided_slice %146 {offsets = [6, 0], sizes = [2, 16], strides = [1, 1]} : vector<16x16xf32> to vector<2x16xf32>
    %cst_58 = arith.constant 0.000000e+00 : f32
    %165 = vector.broadcast %cst_58 : f32 to vector<1x16xf32>
    %166 = tpu.concatenate %164, %165 in 0 : vector<2x16xf32>, vector<1x16xf32> -> vector<3x16xf32>
    %167 = vector.extract_strided_slice %146 {offsets = [8, 0], sizes = [2, 16], strides = [1, 1]} : vector<16x16xf32> to vector<2x16xf32>
    %cst_59 = arith.constant 0.000000e+00 : f32
    %168 = vector.broadcast %cst_59 : f32 to vector<1x16xf32>
    %169 = tpu.concatenate %168, %167 in 0 : vector<1x16xf32>, vector<2x16xf32> -> vector<3x16xf32>
    %170 = vector.extract_strided_slice %146 {offsets = [8, 0], sizes = [3, 16], strides = [1, 1]} : vector<16x16xf32> to vector<3x16xf32>
    %171 = vector.extract_strided_slice %146 {offsets = [9, 0], sizes = [3, 16], strides = [1, 1]} : vector<16x16xf32> to vector<3x16xf32>
    %172 = vector.extract_strided_slice %146 {offsets = [10, 0], sizes = [2, 16], strides = [1, 1]} : vector<16x16xf32> to vector<2x16xf32>
    %cst_60 = arith.constant 0.000000e+00 : f32
    %173 = vector.broadcast %cst_60 : f32 to vector<1x16xf32>
    %174 = tpu.concatenate %172, %173 in 0 : vector<2x16xf32>, vector<1x16xf32> -> vector<3x16xf32>
    %175 = tpu.concatenate %147, %148, %149, %150, %153, %154, %155, %158, %161, %162, %163, %166, %169, %170, %171, %174 in 1 : vector<3x16xf32>, vector<3x16xf32>, vector<3x16xf32>, vector<3x16xf32>, vector<3x16xf32>, vector<3x16xf32>, vector<3x16xf32>, vector<3x16xf32>, vector<3x16xf32>, vector<3x16xf32>, vector<3x16xf32>, vector<3x16xf32>, vector<3x16xf32>, vector<3x16xf32>, vector<3x16xf32>, vector<3x16xf32> -> vector<3x256xf32>
    %176 = vector.extract_strided_slice %146 {offsets = [0, 0], sizes = [2, 16], strides = [1, 1]} : vector<16x16xf32> to vector<2x16xf32>
    %cst_61 = arith.constant 0.000000e+00 : f32
    %177 = vector.broadcast %cst_61 : f32 to vector<1x16xf32>
    %178 = tpu.concatenate %177, %176 in 0 : vector<1x16xf32>, vector<2x16xf32> -> vector<3x16xf32>
    %179 = vector.extract_strided_slice %146 {offsets = [0, 0], sizes = [3, 16], strides = [1, 1]} : vector<16x16xf32> to vector<3x16xf32>
    %180 = vector.extract_strided_slice %146 {offsets = [1, 0], sizes = [3, 16], strides = [1, 1]} : vector<16x16xf32> to vector<3x16xf32>
    %181 = vector.extract_strided_slice %146 {offsets = [2, 0], sizes = [2, 16], strides = [1, 1]} : vector<16x16xf32> to vector<2x16xf32>
    %cst_62 = arith.constant 0.000000e+00 : f32
    %182 = vector.broadcast %cst_62 : f32 to vector<1x16xf32>
    %183 = tpu.concatenate %181, %182 in 0 : vector<2x16xf32>, vector<1x16xf32> -> vector<3x16xf32>
    %184 = vector.extract_strided_slice %146 {offsets = [4, 0], sizes = [2, 16], strides = [1, 1]} : vector<16x16xf32> to vector<2x16xf32>
    %cst_63 = arith.constant 0.000000e+00 : f32
    %185 = vector.broadcast %cst_63 : f32 to vector<1x16xf32>
    %186 = tpu.concatenate %185, %184 in 0 : vector<1x16xf32>, vector<2x16xf32> -> vector<3x16xf32>
    %187 = vector.extract_strided_slice %146 {offsets = [4, 0], sizes = [3, 16], strides = [1, 1]} : vector<16x16xf32> to vector<3x16xf32>
    %188 = vector.extract_strided_slice %146 {offsets = [5, 0], sizes = [3, 16], strides = [1, 1]} : vector<16x16xf32> to vector<3x16xf32>
    %189 = vector.extract_strided_slice %146 {offsets = [6, 0], sizes = [2, 16], strides = [1, 1]} : vector<16x16xf32> to vector<2x16xf32>
    %cst_64 = arith.constant 0.000000e+00 : f32
    %190 = vector.broadcast %cst_64 : f32 to vector<1x16xf32>
    %191 = tpu.concatenate %189, %190 in 0 : vector<2x16xf32>, vector<1x16xf32> -> vector<3x16xf32>
    %192 = vector.extract_strided_slice %146 {offsets = [8, 0], sizes = [2, 16], strides = [1, 1]} : vector<16x16xf32> to vector<2x16xf32>
    %cst_65 = arith.constant 0.000000e+00 : f32
    %193 = vector.broadcast %cst_65 : f32 to vector<1x16xf32>
    %194 = tpu.concatenate %193, %192 in 0 : vector<1x16xf32>, vector<2x16xf32> -> vector<3x16xf32>
    %195 = vector.extract_strided_slice %146 {offsets = [8, 0], sizes = [3, 16], strides = [1, 1]} : vector<16x16xf32> to vector<3x16xf32>
    %196 = vector.extract_strided_slice %146 {offsets = [9, 0], sizes = [3, 16], strides = [1, 1]} : vector<16x16xf32> to vector<3x16xf32>
    %197 = vector.extract_strided_slice %146 {offsets = [10, 0], sizes = [2, 16], strides = [1, 1]} : vector<16x16xf32> to vector<2x16xf32>
    %cst_66 = arith.constant 0.000000e+00 : f32
    %198 = vector.broadcast %cst_66 : f32 to vector<1x16xf32>
    %199 = tpu.concatenate %197, %198 in 0 : vector<2x16xf32>, vector<1x16xf32> -> vector<3x16xf32>
    %200 = vector.extract_strided_slice %146 {offsets = [12, 0], sizes = [2, 16], strides = [1, 1]} : vector<16x16xf32> to vector<2x16xf32>
    %cst_67 = arith.constant 0.000000e+00 : f32
    %201 = vector.broadcast %cst_67 : f32 to vector<1x16xf32>
    %202 = tpu.concatenate %201, %200 in 0 : vector<1x16xf32>, vector<2x16xf32> -> vector<3x16xf32>
    %203 = vector.extract_strided_slice %146 {offsets = [12, 0], sizes = [3, 16], strides = [1, 1]} : vector<16x16xf32> to vector<3x16xf32>
    %204 = vector.extract_strided_slice %146 {offsets = [13, 0], sizes = [3, 16], strides = [1, 1]} : vector<16x16xf32> to vector<3x16xf32>
    %205 = vector.extract_strided_slice %146 {offsets = [14, 0], sizes = [2, 16], strides = [1, 1]} : vector<16x16xf32> to vector<2x16xf32>
    %cst_68 = arith.constant 0.000000e+00 : f32
    %206 = vector.broadcast %cst_68 : f32 to vector<1x16xf32>
    %207 = tpu.concatenate %205, %206 in 0 : vector<2x16xf32>, vector<1x16xf32> -> vector<3x16xf32>
    %208 = tpu.concatenate %178, %179, %180, %183, %186, %187, %188, %191, %194, %195, %196, %199, %202, %203, %204, %207 in 1 : vector<3x16xf32>, vector<3x16xf32>, vector<3x16xf32>, vector<3x16xf32>, vector<3x16xf32>, vector<3x16xf32>, vector<3x16xf32>, vector<3x16xf32>, vector<3x16xf32>, vector<3x16xf32>, vector<3x16xf32>, vector<3x16xf32>, vector<3x16xf32>, vector<3x16xf32>, vector<3x16xf32>, vector<3x16xf32> -> vector<3x256xf32>
    %209 = vector.extract_strided_slice %146 {offsets = [4, 0], sizes = [2, 16], strides = [1, 1]} : vector<16x16xf32> to vector<2x16xf32>
    %cst_69 = arith.constant 0.000000e+00 : f32
    %210 = vector.broadcast %cst_69 : f32 to vector<1x16xf32>
    %211 = tpu.concatenate %210, %209 in 0 : vector<1x16xf32>, vector<2x16xf32> -> vector<3x16xf32>
    %212 = vector.extract_strided_slice %146 {offsets = [4, 0], sizes = [3, 16], strides = [1, 1]} : vector<16x16xf32> to vector<3x16xf32>
    %213 = vector.extract_strided_slice %146 {offsets = [5, 0], sizes = [3, 16], strides = [1, 1]} : vector<16x16xf32> to vector<3x16xf32>
    %214 = vector.extract_strided_slice %146 {offsets = [6, 0], sizes = [2, 16], strides = [1, 1]} : vector<16x16xf32> to vector<2x16xf32>
    %cst_70 = arith.constant 0.000000e+00 : f32
    %215 = vector.broadcast %cst_70 : f32 to vector<1x16xf32>
    %216 = tpu.concatenate %214, %215 in 0 : vector<2x16xf32>, vector<1x16xf32> -> vector<3x16xf32>
    %217 = vector.extract_strided_slice %146 {offsets = [8, 0], sizes = [2, 16], strides = [1, 1]} : vector<16x16xf32> to vector<2x16xf32>
    %cst_71 = arith.constant 0.000000e+00 : f32
    %218 = vector.broadcast %cst_71 : f32 to vector<1x16xf32>
    %219 = tpu.concatenate %218, %217 in 0 : vector<1x16xf32>, vector<2x16xf32> -> vector<3x16xf32>
    %220 = vector.extract_strided_slice %146 {offsets = [8, 0], sizes = [3, 16], strides = [1, 1]} : vector<16x16xf32> to vector<3x16xf32>
    %221 = vector.extract_strided_slice %146 {offsets = [9, 0], sizes = [3, 16], strides = [1, 1]} : vector<16x16xf32> to vector<3x16xf32>
    %222 = vector.extract_strided_slice %146 {offsets = [10, 0], sizes = [2, 16], strides = [1, 1]} : vector<16x16xf32> to vector<2x16xf32>
    %cst_72 = arith.constant 0.000000e+00 : f32
    %223 = vector.broadcast %cst_72 : f32 to vector<1x16xf32>
    %224 = tpu.concatenate %222, %223 in 0 : vector<2x16xf32>, vector<1x16xf32> -> vector<3x16xf32>
    %225 = vector.extract_strided_slice %146 {offsets = [12, 0], sizes = [2, 16], strides = [1, 1]} : vector<16x16xf32> to vector<2x16xf32>
    %cst_73 = arith.constant 0.000000e+00 : f32
    %226 = vector.broadcast %cst_73 : f32 to vector<1x16xf32>
    %227 = tpu.concatenate %226, %225 in 0 : vector<1x16xf32>, vector<2x16xf32> -> vector<3x16xf32>
    %228 = vector.extract_strided_slice %146 {offsets = [12, 0], sizes = [3, 16], strides = [1, 1]} : vector<16x16xf32> to vector<3x16xf32>
    %229 = vector.extract_strided_slice %146 {offsets = [13, 0], sizes = [3, 16], strides = [1, 1]} : vector<16x16xf32> to vector<3x16xf32>
    %230 = vector.extract_strided_slice %146 {offsets = [14, 0], sizes = [2, 16], strides = [1, 1]} : vector<16x16xf32> to vector<2x16xf32>
    %cst_74 = arith.constant 0.000000e+00 : f32
    %231 = vector.broadcast %cst_74 : f32 to vector<1x16xf32>
    %232 = tpu.concatenate %230, %231 in 0 : vector<2x16xf32>, vector<1x16xf32> -> vector<3x16xf32>
    %cst_75 = arith.constant 0.000000e+00 : f32
    %233 = vector.broadcast %cst_75 : f32 to vector<3x16xf32>
    %cst_76 = arith.constant 0.000000e+00 : f32
    %234 = vector.broadcast %cst_76 : f32 to vector<3x16xf32>
    %cst_77 = arith.constant 0.000000e+00 : f32
    %235 = vector.broadcast %cst_77 : f32 to vector<3x16xf32>
    %cst_78 = arith.constant 0.000000e+00 : f32
    %236 = vector.broadcast %cst_78 : f32 to vector<3x16xf32>
    %237 = tpu.concatenate %211, %212, %213, %216, %219, %220, %221, %224, %227, %228, %229, %232, %233, %234, %235, %236 in 1 : vector<3x16xf32>, vector<3x16xf32>, vector<3x16xf32>, vector<3x16xf32>, vector<3x16xf32>, vector<3x16xf32>, vector<3x16xf32>, vector<3x16xf32>, vector<3x16xf32>, vector<3x16xf32>, vector<3x16xf32>, vector<3x16xf32>, vector<3x16xf32>, vector<3x16xf32>, vector<3x16xf32>, vector<3x16xf32> -> vector<3x256xf32>
    %238 = tpu.concatenate %175, %208, %237 in 0 : vector<3x256xf32>, vector<3x256xf32>, vector<3x256xf32> -> vector<9x256xf32>
    %c0_79 = arith.constant 0 : index
    %c0_80 = arith.constant 0 : index
    %239 = vector.load %arg6[%c0_79, %c0_80] : memref<256x6xf32, #tpu.memory_space<vmem>>, vector<256x6xf32>
    %cst_81 = arith.constant dense<0.000000e+00> : vector<9x6xf32>
    %240 = tpu.matmul %238, %239, %cst_81 {dimension_numbers = #tpu.dot_dimension_numbers<[1], [0], [0], [1], [0, 0, 1, 1], [], []>} : vector<9x256xf32>, vector<256x6xf32>, vector<9x6xf32> -> vector<9x6xf32>
    %c0_82 = arith.constant 0 : index
    %c0_83 = arith.constant 0 : index
    %241 = vector.load %arg7[%c0_82, %c0_83] : memref<1x6xf32, #tpu.memory_space<vmem>>, vector<1x6xf32>
    %242 = vector.broadcast %241 : vector<1x6xf32> to vector<9x6xf32>
    %243 = arith.addf %240, %242 : vector<9x6xf32>
    %c0_84 = arith.constant 0 : index
    %c0_85 = arith.constant 0 : index
    %c0_86 = arith.constant 0 : index
    %244 = vector.load %arg8[%c0_84, %c0_85, %c0_86] : memref<1x9x6xf32, #tpu.memory_space<vmem>>, vector<1x9x6xf32>
    %245 = vector.shape_cast %244 : vector<1x9x6xf32> to vector<9x6xf32>
    %246 = vector.shape_cast %243 : vector<9x6xf32> to vector<1x9x6xf32>
    tpu.vector_store %arg8[%c0_84, %c0_85, %c0_86], %246 {strides = array<i32>} : memref<1x9x6xf32, #tpu.memory_space<vmem>>, vector<1x9x6xf32>,
    return
  }
  func.func @transform_0(%arg0: i32) -> (i32, i32, i32) {
    %c0_i32 = arith.constant 0 : i32
    %c0_i32_0 = arith.constant 0 : i32
    %c0_i32_1 = arith.constant 0 : i32
    return %arg0, %c0_i32, %c0_i32_0 : i32, i32, i32
  }
  func.func @transform_1(%arg0: i32) -> (i32, i32) {
    %c0_i32 = arith.constant 0 : i32
    %c0_i32_0 = arith.constant 0 : i32
    %c0_i32_1 = arith.constant 0 : i32
    return %c0_i32, %c0_i32_0 : i32, i32
  }
  func.func @transform_2(%arg0: i32) -> (i32, i32) {
    %c0_i32 = arith.constant 0 : i32
    %c0_i32_0 = arith.constant 0 : i32
    %c0_i32_1 = arith.constant 0 : i32
    return %c0_i32, %c0_i32_0 : i32, i32
  }
  func.func @transform_3(%arg0: i32) -> (i32, i32) {
    %c0_i32 = arith.constant 0 : i32
    %c0_i32_0 = arith.constant 0 : i32
    %c0_i32_1 = arith.constant 0 : i32
    return %c0_i32, %c0_i32_0 : i32, i32
  }
  func.func @transform_4(%arg0: i32) -> (i32, i32) {
    %c0_i32 = arith.constant 0 : i32
    %c0_i32_0 = arith.constant 0 : i32
    %c0_i32_1 = arith.constant 0 : i32
    return %c0_i32, %c0_i32_0 : i32, i32
  }
  func.func @transform_5(%arg0: i32) -> (i32, i32) {
    %c0_i32 = arith.constant 0 : i32
    %c0_i32_0 = arith.constant 0 : i32
    %c0_i32_1 = arith.constant 0 : i32
    return %c0_i32, %c0_i32_0 : i32, i32
  }
  func.func @transform_6(%arg0: i32) -> (i32, i32) {
    %c0_i32 = arith.constant 0 : i32
    %c0_i32_0 = arith.constant 0 : i32
    %c0_i32_1 = arith.constant 0 : i32
    return %c0_i32, %c0_i32_0 : i32, i32
  }
  func.func @transform_7(%arg0: i32) -> (i32, i32, i32) {
    %c0_i32 = arith.constant 0 : i32
    %c0_i32_0 = arith.constant 0 : i32
    %c0_i32_1 = arith.constant 0 : i32
    return %arg0, %c0_i32, %c0_i32_0 : i32, i32, i32
  }
}

</mosaic_0001>

<bundles_post_ra>
// kernel: squeeze.0
= control target key start
LH: loop header
LB: loop body
LE: loop exit
PB: predicated region body
PF: predicated region fallthrough
CT: control target
= control target key end

     0   :  { %s130_s0 = inlined_call_operand.vmem [shape: f32[2,9], index: 0, kind: input, shape index: {}]   ;;  %s131_s1 = inlined_call_operand.hbm [shape: f32[2,1,3,3], index: 1, kind: output, shape index: {}]  }
   0x1   :  { %v5_v0 = vld [vmem:[%s130_s0] sm:$0x3] }
   0x2   :  { %6 = vst [vmem:[#allocation3] sm:$0x3] %v5_v0 }
   0x3   :  { %2 = vsyncpa [#allocation1], 0  ;;  %s11_s0 = smov 3  ;;  %s19_s8 = smov 3  ;;  %vm8_vm0 = vcmask 23552  }
   0x4   :  { %s102_s9 = smov 125   ;;  %s103_s10 = smov 122  }
   0x5   :  { %s104_s11 = smov [#allocation0]  }
   0x6   :  { %s65_s12 = sshll.u32 %s104_s11, 4  ;;  %s66_s12 = int_to_ptr.vmem [resolvable:$true] %s65_s12 }
   0x7   :  { %s78_s13 = scalar_lea.vmem %s66_s12, 96  ;;  %p83_p1 = scmp.lt.s32.totalorder %s66_s12, %s66_s12 }
   0x8   :  { %p79_p0 = scmp.ne.s32.totalorder %s66_s12, %s78_s13  ;;  %p84_p2 = scmp.lt.s32.totalorder %s78_s13, %s78_s13 }
   0x9   :  { %v12_v1 = vld [vmem:[#allocation3 + $0x1] ss:$-1 sm:%s11_s0]  }
   0xa   :  { %v7_v2 = vld [vmem:[#allocation3] sm:$0x3]   ;;  %13 = vrot.lane.b32.xlu0 %v12_v1, %s102_s9  ;;  %p85_p3 = por %p84_p2, %p83_p1 }
   0xb   :  { %9 = vst.msk [vmem:[#allocation2] ss:$24 sm:$0x3] %vm8_vm0, %v7_v2   ;;  %v20_v3 = vld [vmem:[#allocation3 + $0x1] ss:$-1 sm:%s19_s8]  }
   0xc   :  { %p86_p4 = pnand %p85_p3, %p79_p0 }
   0xe   :  { %21 = vrot.lane.b32.xlu0 %v20_v3, %s103_s10 }
  0x12   :  { %v29_v4 = vld [vmem:[#allocation2] sm:$0x1]  ;;  %v44_v5 = vld [vmem:[#allocation2 + $0x18] sm:$0x1] }
  0x13   :  { %31 = vst [vmem:[#allocation0] sm:$0x1] %v29_v4  ;;  %48 = vst [vmem:[#allocation0 + $0x3] sm:$0x1] %v44_v5 }
  0x7c   :  { %v14_v6 = vpop.permute.xlu0 %13  }
  0x7d   :  { %17 = vst.msk [vmem:[#allocation2 + $0x20] ss:$-24 sm:$0x3] %vm8_vm0, %v14_v6  }
  0x80   :  { %v22_v7 = vpop.permute.xlu0 %21  }
  0x81   :  { %25 = vst.msk [vmem:[#allocation2 + $0x28] ss:$-24 sm:$0x3] %vm8_vm0, %v22_v7  }
  0x84   :  { %v33_v8 = vld [vmem:[#allocation2 + $0x8] sm:$0x1]  ;;  %v50_v9 = vld [vmem:[#allocation2 + $0x20] sm:$0x1] }
  0x85   :  { %36 = vst [vmem:[#allocation0 + $0x1] sm:$0x1] %v33_v8  ;;  %54 = vst [vmem:[#allocation0 + $0x4] sm:$0x1] %v50_v9 }
  0x88   :  { %v38_v10 = vld [vmem:[#allocation2 + $0x10] sm:$0x1]  ;;  %v56_v11 = vld [vmem:[#allocation2 + $0x28] sm:$0x1] }
  0x89   :  { %42 = vst [vmem:[#allocation0 + $0x2] sm:$0x1] %v38_v10  ;;  %60 = vst [vmem:[#allocation0 + $0x5] sm:$0x1] %v56_v11 }
  0x8a   :  { %89 = shalt.err (!%p86_p4)
}
  0x8b   :  { %s90_s16 = scalar_lea.hbm %s131_s1, 96 }
  0x8c   :  { %p91_p5 = scmp.ne.s32.totalorder %s131_s1, %s90_s16  ;;  %p94_p6 = scmp.lt.u32.totalorder %s90_s16, %s131_s1 }
  0x8e   :  { %p96_p7 = pnand %p94_p6, %p91_p5 }
  0x90   :  { %99 = shalt.err (!%p96_p7)
}
  0x91   :  { %68 = dma.vmem_to_hbm [thread:$0]  %s66_s12, 96, %s131_s1, [#allocation1]  }
  0x92   :  { %100 = dma.done.wait [#allocation1], 96  }
  0x93   :  { %101 = vsyncadd [#allocation1], 4294967200 }
  0x94   :  { %70 = vsyncpa [#allocation1], 1 }

// kernel: a_call__.1
= control target key start
LH: loop header
LB: loop body
LE: loop exit
PB: predicated region body
PF: predicated region fallthrough
CT: control target
= control target key end

     0   :  { %s1740_s24 = smov 0   ;;  %s2330_s0 = inlined_call_operand.vmem [shape: f32[2,64,64], index: 0, kind: input, shape index: {}]   ;;  %s2331_s1 = inlined_call_operand.vmem [shape: f32[64,8], index: 1, kind: input, shape index: {}]   ;;  %s2332_s2 = inlined_call_operand.vmem [shape: f32[1,8], index: 2, kind: input, shape index: {}]   ;;  %s2333_s3 = inlined_call_operand.vmem [shape: f32[128,16], index: 3, kind: input, shape index: {}]   ;;  %s2334_s4 = inlined_call_operand.vmem [shape: f32[1,16], index: 4, kind: input, shape index: {}]   ;;  %s2335_s5 = inlined_call_operand.vmem [shape: f32[256,6], index: 5, kind: input, shape index: {}]   ;;  %s2336_s6 = inlined_call_operand.vmem [shape: f32[1,6], index: 6, kind: input, shape index: {}]   ;;  %s2337_s7 = inlined_call_operand.vmem [shape: f32[2,9,6], index: 7, kind: output, shape index: {}]  }
   0x1 LB: > { %s1230_s25 = sadd.s32 4294967295, %s1683_s24   ;;  %p1234_p0 = scmp.ge.s32.totalorder %s1683_s24, 1  ;;  %s1683_s24 = sphi %s1740_s24, %s17_s24  }
   0x2   : > { %p237_p1 = scmp.lt.s32.totalorder %s1683_s24, 3 }
   0x4   : > { %p238_p2 = pnand %p1234_p0, %p237_p1 }
   0x5   : > { %v287_v0 = vld [vmem:[%s2331_s1] sm:$0xff] (!%p238_p2)  ;;  %v288_v1 = vld [vmem:[%s2331_s1 + $0x8] sm:$0xff] (!%p238_p2)  ;;  %v289_v2 = vld [vmem:[%s2331_s1 + $0x10] sm:$0xff] (!%p238_p2)  ;;  %p269_p3 = scmp.lt.s32.totalorder (!%p238_p2), %s1230_s25, 1  ;;  %vm302_vm0 = vcmask (!%p238_p2), 523264   ;;  %vm464_vm3 = vcmask (!%p238_p2), 1042432  }
   0x6   : > { %241 = sbr.rel (%p238_p2) target bundleno = 1013 (0x3f5), region = 48  ;;  %v1389_v3 = vpack.c.bf16 (!%p238_p2), %v288_v1, %v287_v0  ;;  %v290_v4 = vld [vmem:[%s2331_s1 + $0x18] sm:$0xff] (!%p238_p2)  ;;  %v291_v6 = vld [vmem:[%s2331_s1 + $0x20] sm:$0xff] (!%p238_p2)  ;;  %v292_v7 = vld [vmem:[%s2331_s1 + $0x28] sm:$0xff] (!%p238_p2)  ;;  %vm459_vm4 = vcmask (!%p238_p2), 1040384   ;;  %s1685_s27 = smov (!%p238_p2), 96  }
   0x7   : > { %v1393_v5 = vpack.c.bf16 (!%p238_p2), %v290_v4, %v289_v2  ;;  %v1397_v8 = vpack.c.bf16 (!%p238_p2), %v292_v7, %v291_v6  ;;  %v293_v9 = vld [vmem:[%s2331_s1 + $0x30] sm:$0xff] (!%p238_p2)  ;;  %v294_v10 = vld [vmem:[%s2331_s1 + $0x38] sm:$0xff] (!%p238_p2)  ;;  %v1789_v20 = vld [vmem:[%s2332_s2] ss:$0 sm:$0xff] (!%p238_p2)  ;;  %s1686_s28 = smov (!%p238_p2), 104   ;;  %s1687_s29 = smov (!%p238_p2), 72  }
   0x8   : > { %1390 = vmatprep.subr.bf16.mxu1 (!%p238_p2), %v1389_v3  ;;  %v1401_v12 = vpack.c.bf16 (!%p238_p2), %v294_v10, %v293_v9  ;;  %s1688_s30 = smov (!%p238_p2), 64   ;;  %s1689_s8 = smov (!%p238_p2), 88   ;;  %vm616_vm11 = vcmask (!%p238_p2), 64512   ;;  %vm524_vm12 = vcmask (!%p238_p2), 130048   ;;  %vm526_vm13 = vcmask (!%p238_p2), 195584  }
   0x9   : > { %1392 = vmatpush3.bf16.msra.mxu1 (!%p238_p2), %v1389_v3  ;;  %s1690_s9 = smov (!%p238_p2), 80   ;;  %s1691_s14 = smov (!%p238_p2), 32   ;;  %vm528_vm14 = vcmask (!%p238_p2), 261120   ;;  %vm530_vm15 = vcmask (!%p238_p2), 326656  }
   0xa   : > { %1394 = vmatprep.subr.bf16.mxu1 (!%p238_p2), %v1393_v5  ;;  %s1693_s20 = smov (!%p238_p2), 40   ;;  %s1695_s16 = smov (!%p238_p2), 8  }
   0xb   : > { %s1696_s17 = smov (!%p238_p2), 24   ;;  %s1697_s26 = smov (!%p238_p2), 16  }
   0xc   : > { %s1698_s21 = smov (!%p238_p2), 112   ;;  %s1699_s22 = smov (!%p238_p2), 120  }
   0xd   : > { %s2339_s25 = smov (!%p269_p3, %s1230_s25), 1  ;;  %1396 = vmatpush3.bf16.msra.mxu1 %v1393_v5 }
   0xe   : > { %s1252_s15 = sshll.u32 %s2339_s25, 6  ;;  %1398 = vmatprep.subr.bf16.mxu1 %v1397_v8 }
   0xf   : > { %s273_s18 = scalar_lea.vmem %s2330_s0, %s1252_s15  ;;  %s1692_s15 = smov 48  }
  0x10   : > { %v279_v11 = vld [vmem:[%s273_s18] sm:$0xff]  ;;  %v280_v13 = vld [vmem:[%s273_s18 + $0x8] sm:$0xff]  ;;  %v281_v14 = vld [vmem:[%s273_s18 + $0x10] sm:$0xff] }
  0x11   : > { %1342 = vmatprep.mubr.msk.f32.mxu1 %vm302_vm0, %v279_v11  ;;  %1400 = vmatpush3.bf16.msra.mxu1 %v1397_v8  ;;  %v282_v15 = vld [vmem:[%s273_s18 + $0x18] sm:$0xff]  ;;  %v283_v16 = vld [vmem:[%s273_s18 + $0x20] sm:$0xff]  ;;  %v284_v17 = vld [vmem:[%s273_s18 + $0x28] sm:$0xff] }
  0x12   : > { %1402 = vmatprep.subr.bf16.mxu1 %v1401_v12  ;;  %v285_v18 = vld [vmem:[%s273_s18 + $0x30] sm:$0xff]  ;;  %v286_v19 = vld [vmem:[%s273_s18 + $0x38] sm:$0xff] }
  0x15   : > { %1404 = vmatpush3.bf16.msra.mxu1 %v1401_v12 }
  0x18   : > { %1343 = vmatmul.mubr.msk.f32.vlgmr.msra.gmra.mrb[0].mxu1 %vm302_vm0, %v280_v13 }
  0x19   : > { %1345 = vmatprep.mubr.msk.f32.mxu1 %vm302_vm0, %v281_v14 }
  0x1c   : > { %1346 = vmatmul.mubr.msk.f32.gmra.mrb[2].mxu1 %vm302_vm0, %v282_v15 }
  0x1d   : > { %1348 = vmatprep.mubr.msk.f32.mxu1 %vm302_vm0, %v283_v16 }
  0x20   : > { %1349 = vmatmul.mubr.msk.f32.gmra.mrb[4].mxu1 %vm302_vm0, %v284_v17 }
  0x21   : > { %1351 = vmatprep.mubr.msk.f32.mxu1 %vm302_vm0, %v285_v18 }
  0x24   : > { %1352 = vmatmul.mubr.msk.f32.gmra.mrb[6].mxu1 %vm302_vm0, %v286_v19 }
  0xeb   : > { %v1344_v21 = vpop.f32.mrb[0].mxu1 }
  0xec   : > { %v399_v22 = vadd.f32 %v1344_v21, %v1789_v20  ;;  %v393_v23 = vpop.f32.mrb[1].mxu1 }
  0xed   : > { %v394_v24 = vadd.f32 %v1789_v20, %v393_v23 }
  0xee   : > { %vm433_vm1 = vcmp.gt.f32.partialorder %v399_v22, 0.0  ;;  %v441_v25 = vmul.f32 0.2, %v399_v22 }
  0xef   : > { %vm432_vm2 = vcmp.gt.f32.partialorder %v394_v24, 0.0  ;;  %v440_v26 = vmul.f32 0.2, %v394_v24  ;;  %v1347_v27 = vpop.f32.mrb[2].mxu1 }
  0xf0   : > { %v1793_v28 = vsel %vm433_vm1, %v399_v22, %v441_v25  ;;  %v409_v29 = vadd.f32 %v1347_v27, %v1789_v20  ;;  %v403_v30 = vpop.f32.mrb[3].mxu1  ;;  %vm532_vm1 = vcmask 392192  }
  0xf1   : > { %v1796_v31 = vsel %vm432_vm2, %v394_v24, %v440_v26  ;;  %v404_v32 = vadd.f32 %v1789_v20, %v403_v30  ;;  %v689_v33 = vrot.slane %v1793_v28, 4  ;;  %v562_v34 = vrot.slane %v1793_v28, 1 }
  0xf2   : > { %vm435_vm5 = vcmp.gt.f32.partialorder %v409_v29, 0.0  ;;  %v443_v35 = vmul.f32 0.2, %v409_v29  ;;  %v516_v36 = vrot.slane %v1796_v31, 4  ;;  %v477_v37 = vrot.slane %v1796_v31, 5 }
  0xf3   : > { %vm434_vm6 = vcmp.gt.f32.partialorder %v404_v32, 0.0  ;;  %v442_v38 = vmul.f32 0.2, %v404_v32  ;;  %v1804_v39 = vsel %vm464_vm3, %v562_v34, 0.0  ;;  %v643_v40 = vrot.slane %v1793_v28, 5  ;;  %v1350_v41 = vpop.f32.mrb[4].mxu1 }
  0xf4   : > { %v1807_v42 = vsel %vm435_vm5, %v409_v29, %v443_v35  ;;  %v1492_v43 = vpack.i.bf16 %v689_v33, %v516_v36  ;;  %v1814_v44 = vsel %vm464_vm3, %v477_v37, 0.0  ;;  %v419_v45 = vadd.f32 %v1350_v41, %v1789_v20  ;;  %v413_v46 = vpop.f32.mrb[5].mxu1 }
  0xf5   : > { %v450_v47 = vsel %vm434_vm6, %v404_v32, %v442_v38  ;;  %v1818_v48 = vsel %vm464_vm3, %v643_v40, 0.0  ;;  %v1602_v49 = vpack.i.bf16 %v1814_v44, %v1804_v39  ;;  %v414_v50 = vadd.f32 %v1789_v20, %v413_v46 }
  0xf6   : > { %1493 = vrot.lane.b32.xlu0 %v1492_v43, %s1685_s27  ;;  %v1497_v51 = vpack.i.bf16 %v1818_v48, %v1814_v44  ;;  %vm437_vm7 = vcmp.gt.f32.partialorder %v419_v45, 0.0  ;;  %v445_v52 = vmul.f32 0.2, %v419_v45  ;;  %v1502_v53 = vpack.i.bf16 %v1807_v42, %v450_v47  ;;  %v779_v43 = vld [vmem:[%s2333_s3] sm:$0xff] }
  0xf7   : > { %vm436_vm8 = vcmp.gt.f32.partialorder %v414_v50, 0.0  ;;  %v444_v54 = vmul.f32 0.2, %v414_v50  ;;  %v505_v55 = vrot.slane %v450_v47, 4  ;;  %v679_v56 = vrot.slane %v1807_v42, 4  ;;  %v1353_v57 = vpop.f32.mrb[6].mxu1 }
  0xf8   : > { %1498 = vrot.lane.b32.xlu1 %v1497_v51, %s1686_s28  ;;  %v453_v58 = vsel %vm437_vm7, %v419_v45, %v445_v52  ;;  %v470_v59 = vrot.slane %v450_v47, 3  ;;  %v640_v60 = vrot.slane %v1807_v42, 3  ;;  %v467_v61 = vrot.slane %v450_v47, 7  ;;  %v423_v62 = vpop.f32.mrb[7].mxu1  ;;  %v780_v45 = vld [vmem:[%s2333_s3 + $0x8] sm:$0xff]  ;;  %v782_v51 = vld [vmem:[%s2333_s3 + $0x18] sm:$0xff] }
  0xf9   : > { %v1830_v63 = vsel %vm436_vm8, %v414_v50, %v444_v54  ;;  %v1507_v0 = vpack.i.bf16 %v679_v56, %v505_v55  ;;  %v1512_v1 = vpack.i.bf16 %v505_v55, %v1807_v42  ;;  %v558_v2 = vrot.slane %v1807_v42, 7  ;;  %v781_v50 = vld [vmem:[%s2333_s3 + $0x10] sm:$0xff]  ;;  %v784_v54 = vld [vmem:[%s2333_s3 + $0x28] sm:$0xff] }
  0xfa   : > { %1503 = vrot.lane.b32.xlu0 %v1502_v53, %s1687_s29  ;;  %v472_v3 = vsel %vm459_vm4, 0.0, %v470_v59  ;;  %v1838_v4 = vsel %vm459_vm4, 0.0, %v640_v60  ;;  %v469_v5 = vsel %vm459_vm4, 0.0, %v467_v61  ;;  %v1532_v6 = vpack.i.bf16 %v453_v58, %v1830_v63  ;;  %v783_v53 = vld [vmem:[%s2333_s3 + $0x20] sm:$0xff]  ;;  %v785_v59 = vld [vmem:[%s2333_s3 + $0x30] sm:$0xff]  ;;  %v786_v60 = vld [vmem:[%s2333_s3 + $0x38] sm:$0xff] }
  0xfb   : > { %v1517_v7 = vpack.i.bf16 %v1838_v4, %v472_v3  ;;  %v560_v8 = vsel %vm459_vm4, 0.0, %v558_v2  ;;  %v429_v9 = vadd.f32 %v1353_v57, %v1789_v20  ;;  %v424_v12 = vadd.f32 %v1789_v20, %v423_v62 }
  0xfc   : > { %1508 = vrot.lane.b32.xlu1 %v1507_v0, %s1687_s29  ;;  %v1522_v10 = vpack.i.bf16 %v560_v8, %v469_v5  ;;  %v1527_v11 = vpack.i.bf16 %v472_v3, %v560_v8  ;;  %v582_v13 = vrot.slane %v1830_v63, 4  ;;  %v735_v15 = vrot.slane %v453_v58, 4  ;;  %s1694_s29 = smov 56   ;;  %v789_v8 = vld [vmem:[%s2333_s3 + $0x50] sm:$0xff] }
  0xfd   : > { %vm439_vm9 = vcmp.gt.f32.partialorder %v429_v9, 0.0  ;;  %v447_v14 = vmul.f32 0.2, %v429_v9  ;;  %v462_v16 = vrot.slane %v1830_v63, 1  ;;  %vm438_vm10 = vcmp.gt.f32.partialorder %v424_v12, 0.0 }
  0xfe   : > { %1518 = vrot.lane.b32.xlu0 %v1517_v7, %s1688_s30  ;;  %v446_v17 = vmul.f32 0.2, %v424_v12  ;;  %v637_v18 = vrot.slane %v453_v58, 1  ;;  %v554_v19 = vrot.slane %v1830_v63, 5  ;;  %v1542_v22 = vpack.i.bf16 %v735_v15, %v582_v13  ;;  %v788_v7 = vld [vmem:[%s2333_s3 + $0x48] sm:$0xff] }
  0xff   : > { %v1850_v21 = vsel %vm439_vm9, %v429_v9, %v447_v14  ;;  %v465_v20 = vsel %vm464_vm3, %v462_v16, 0.0  ;;  %v715_v23 = vrot.slane %v453_v58, 5  ;;  %v1587_v37 = vpack.i.bf16 %v1793_v28, %v1796_v31  ;;  %v792_v14 = vld [vmem:[%s2333_s3 + $0x68] sm:$0xff]  ;;  %v793_v16 = vld [vmem:[%s2333_s3 + $0x70] sm:$0xff] }
 0x100   : > { %1513 = vrot.lane.b32.xlu1 %v1512_v1, %s1689_s8  ;;  %v1854_v24 = vsel %vm438_vm10, %v424_v12, %v446_v17  ;;  %v639_v25 = vsel %vm464_vm3, %v637_v18, 0.0  ;;  %v556_v26 = vsel %vm464_vm3, %v554_v19, 0.0  ;;  %v725_v27 = vrot.slane %v1850_v21, 4  ;;  %v794_v17 = vld [vmem:[%s2333_s3 + $0x78] sm:$0xff] }
 0x101   : > { %v1547_v29 = vpack.i.bf16 %v639_v25, %v465_v20  ;;  %v717_v30 = vsel %vm464_vm3, %v715_v23, 0.0  ;;  %v1562_v32 = vpack.i.bf16 %v1850_v21, %v1854_v24  ;;  %v572_v35 = vrot.slane %v1854_v24, 4 }
 0x102   : > { %1523 = vrot.lane.b32.xlu0 %v1522_v10, %s1688_s30  ;;  %v1552_v34 = vpack.i.bf16 %v717_v30, %v556_v26  ;;  %v1870_v40 = vpack.i.bf16 %v516_v36, %v1793_v28  ;;  %v474_v41 = vrot.slane %v1796_v31, 1  ;;  %v1405_v47 = vpack.c.bf16 %v780_v45, %v779_v43 }
 0x103   : > { %v1572_v38 = vpack.i.bf16 %v725_v27, %v572_v35  ;;  %v1409_v52 = vpack.c.bf16 %v782_v51, %v781_v50  ;;  %v1413_v55 = vpack.c.bf16 %v784_v54, %v783_v53  ;;  %v551_v57 = vrot.slane %v1854_v24, 3 }
 0x104   : > { %1528 = vrot.lane.b32.xlu1 %v1527_v11, %s1690_s9  ;;  %v1881_v46 = vsel %vm464_vm3, %v474_v41, 0.0  ;;  %1406 = vmatprep.subr.bf16.mxu1 %v1405_v47  ;;  %v712_v58 = vrot.slane %v1850_v21, 3  ;;  %v1417_v61 = vpack.c.bf16 %v786_v60, %v785_v59  ;;  %v457_v62 = vrot.slane %v1854_v24, 7  ;;  %v790_v11 = vld [vmem:[%s2333_s3 + $0x58] sm:$0xff] }
 0x105   : > { %v1597_v36 = vpack.i.bf16 %v1804_v39, %v1881_v46  ;;  %1408 = vmatpush3.bf16.msra.mxu1 %v1405_v47  ;;  %v633_v63 = vrot.slane %v1850_v21, 7  ;;  %v1911_v0 = vsel %vm459_vm4, 0.0, %v551_v57  ;;  %v1425_v12 = vpack.c.bf16 %v790_v11, %v789_v8 }
 0x106   : > { %1533 = vrot.lane.b32.xlu0 %v1532_v6, %s1691_s14  ;;  %1410 = vmatprep.subr.bf16.mxu1 %v1409_v52  ;;  %v714_v1 = vsel %vm459_vm4, 0.0, %v712_v58  ;;  %v1915_v2 = vsel %vm459_vm4, 0.0, %v457_v62  ;;  %vm534_vm2 = vcmask 457728   ;;  %vm537_vm5 = vcmask 588800  }
 0x107   : > { %v1918_v3 = vsel %vm459_vm4, 0.0, %v633_v63  ;;  %v1577_v5 = vpack.i.bf16 %v714_v1, %v1911_v0  ;;  %vm539_vm6 = vcmask 654336   ;;  %vm541_vm7 = vcmask 719872  }
 0x108   : > { %1538 = vrot.lane.b32.xlu1 %v1532_v6, %s1692_s15  ;;  %v787_v6 = vld [vmem:[%s2333_s3 + $0x40] sm:$0xff]  ;;  %v1582_v9 = vpack.i.bf16 %v1918_v3, %v1915_v2  ;;  %vm543_vm8 = vcmask 785408   ;;  %vm545_vm9 = vcmask 850944   ;;  %vm547_vm10 = vcmask 916480  }
 0x109   : > { %1412 = vmatpush3.bf16.msra.mxu1 %v1409_v52  ;;  %v1421_v10 = vpack.c.bf16 %v788_v7, %v787_v6 }
 0x10a   : > { %1543 = vrot.lane.b32.xlu0 %v1542_v22, %s1692_s15  ;;  %1414 = vmatprep.subr.bf16.mxu1 %v1413_v55 }
 0x10c   : > { %1548 = vrot.lane.b32.xlu1 %v1547_v29, %s1693_s20 }
 0x10d   : > { %1416 = vmatpush3.bf16.msra.mxu1 %v1413_v55 }
 0x10e   : > { %656 = vrot.lane.b32.xlu0 %v582_v13, %s1691_s14  ;;  %1418 = vmatprep.subr.bf16.mxu1 %v1417_v61  ;;  %v791_v13 = vld [vmem:[%s2333_s3 + $0x60] sm:$0xff] }
 0x10f   : > { %v1429_v15 = vpack.c.bf16 %v792_v14, %v791_v13 }
 0x110   : > { %1553 = vrot.lane.b32.xlu1 %v1552_v34, %s1694_s29 }
 0x111   : > { %1420 = vmatpush3.bf16.msra.mxu1 %v1417_v61 }
 0x112   : > { %1558 = vrot.lane.b32.xlu0 %v1547_v29, %s1694_s29  ;;  %1422 = vmatprep.subr.bf16.mxu1 %v1421_v10 }
 0x114   : > { %659 = vrot.lane.b32.xlu1 %v556_v26, %s1693_s20 }
 0x115   : > { %1424 = vmatpush3.bf16.msra.mxu1 %v1421_v10 }
 0x116   : > { %1563 = vrot.lane.b32.xlu0 %v1562_v32, %s1695_s16  ;;  %1426 = vmatprep.subr.bf16.mxu1 %v1425_v12 }
 0x118   : > { %1573 = vrot.lane.b32.xlu1 %v1572_v38, %s1696_s17 }
 0x119   : > { %1428 = vmatpush3.bf16.msra.mxu1 %v1425_v12 }
 0x11a   : > { %1568 = vrot.lane.b32.xlu0 %v1562_v32, %s1696_s17  ;;  %1430 = vmatprep.subr.bf16.mxu1 %v1429_v15 }
 0x11c   : > { %646 = vrot.lane.b32.xlu1 %v572_v35, %s1695_s16 }
 0x11d   : > { %1432 = vmatpush3.bf16.msra.mxu1 %v1429_v15 }
 0x11e   : > { %1578 = vrot.lane.b32.xlu0 %v1577_v5, %s1697_s26 }
 0x120   : > { %1583 = vrot.lane.b32.xlu1 %v1582_v9, %s1697_s26 }
 0x122   : > { %676 = vrot.lane.b32.xlu0 %v1838_v4, %s1690_s9  ;;  %v1433_v4 = vpack.c.bf16 %v794_v17, %v793_v16 }
 0x124   : > { %1588 = vrot.lane.b32.xlu1 %v1587_v37, %s1685_s27  ;;  %1434 = vmatprep.subr.bf16.mxu1 %v1433_v4 }
 0x125   : > { %1436 = vmatpush3.bf16.msra.mxu1 %v1433_v4 }
 0x126   : > { %1593 = vrot.lane.b32.xlu0 %v1870_v40, %s1698_s21 }
 0x128   : > { %680 = vrot.lane.b32.xlu1 %v679_v56, %s1689_s8 }
 0x12a   : > { %1598 = vrot.lane.b32.xlu0 %v1597_v36, %s1686_s28 }
 0x12c   : > { %1603 = vrot.lane.b32.xlu1 %v1602_v49, %s1699_s22 }
 0x12e   : > { %690 = vrot.lane.b32.xlu0 %v689_v33, %s1698_s21 }
 0x130   : > { %694 = vrot.lane.b32.xlu1 %v1818_v48, %s1699_s22 }
 0x168   : > { %v1971_v31 = vpop.permute.xlu0 %1493 }
 0x169   : > { %v1496_v26 = vunpack.i.h.bf16 %v1971_v31  ;;  %v1495_v27 = vunpack.i.l.bf16 %v1971_v31 }
 0x16a   : > { %v1973_v42 = vpop.permute.xlu1 %1498 }
 0x16b   : > { %v1501_v29 = vunpack.i.h.bf16 %v1973_v42  ;;  %v1500_v30 = vunpack.i.l.bf16 %v1973_v42 }
 0x16c   : > { %v1975_v56 = vpop.permute.xlu0 %1503 }
 0x16d   : > { %v1506_v32 = vunpack.i.h.bf16 %v1975_v56  ;;  %v1505_v35 = vunpack.i.l.bf16 %v1975_v56 }
 0x16e   : > { %v1977_v18 = vpop.permute.xlu1 %1508 }
 0x16f   : > { %v1511_v37 = vunpack.i.h.bf16 %v1977_v18  ;;  %v1510_v38 = vunpack.i.l.bf16 %v1977_v18 }
 0x170   : > { %v1979_v19 = vpop.permute.xlu0 %1518 }
 0x171   : > { %v1521_v40 = vunpack.i.h.bf16 %v1979_v19  ;;  %v1520_v41 = vunpack.i.l.bf16 %v1979_v19 }
 0x172   : > { %v1981_v21 = vpop.permute.xlu1 %1513 }
 0x173   : > { %v1516_v43 = vunpack.i.h.bf16 %v1981_v21  ;;  %v1515_v45 = vunpack.i.l.bf16 %v1981_v21 }
 0x174   : > { %v1983_v39 = vpop.permute.xlu0 %1523 }
 0x175   : > { %v1526_v46 = vunpack.i.h.bf16 %v1983_v39  ;;  %v1525_v36 = vunpack.i.l.bf16 %v1983_v39 }
 0x176   : > { %v1985_v44 = vpop.permute.xlu1 %1528 }
 0x177   : > { %v1531_v50 = vunpack.i.h.bf16 %v1985_v44  ;;  %v1530_v51 = vunpack.i.l.bf16 %v1985_v44 }
 0x178   : > { %v1987_v28 = vpop.permute.xlu0 %1533 }
 0x179   : > { %v1536_v52 = vunpack.i.h.bf16 %v1987_v28  ;;  %v1535_v53 = vunpack.i.l.bf16 %v1987_v28 }
 0x17a   : > { %v1989_v33 = vpop.permute.xlu1 %1538 }
 0x17b   : > { %v1541_v54 = vunpack.i.h.bf16 %v1989_v33  ;;  %v1540_v59 = vunpack.i.l.bf16 %v1989_v33 }
 0x17c   : > { %v1991_v48 = vpop.permute.xlu0 %1543 }
 0x17d   : > { %v1546_v60 = vunpack.i.h.bf16 %v1991_v48  ;;  %v1545_v61 = vunpack.i.l.bf16 %v1991_v48 }
 0x17e   : > { %v1993_v49 = vpop.permute.xlu1 %1548 }
 0x17f   : > { %v1551_v62 = vunpack.i.h.bf16 %v1993_v49  ;;  %v1550_v63 = vunpack.i.l.bf16 %v1993_v49 }
 0x180   : > { %v1995_v22 = vpop.permute.xlu0 %656 }
 0x182   : > { %v1997_v20 = vpop.permute.xlu1 %1553 }
 0x183   : > { %v1556_v1 = vunpack.i.h.bf16 %v1997_v20  ;;  %v1555_v5 = vunpack.i.l.bf16 %v1997_v20 }
 0x184   : > { %v1999_v23 = vpop.permute.xlu0 %1558 }
 0x185   : > { %v1561_v6 = vunpack.i.h.bf16 %v1999_v23  ;;  %v1560_v8 = vunpack.i.l.bf16 %v1999_v23 }
 0x186   : > { %v2001_v24 = vpop.permute.xlu1 %659 }
 0x188   : > { %v1564_v25 = vpop.permute.xlu0 %1563 }
 0x189   : > { %v1566_v55 = vunpack.i.h.bf16 %v1564_v25  ;;  %v1565_v57 = vunpack.i.l.bf16 %v1564_v25 }
 0x18a   : > { %v1574_v34 = vpop.permute.xlu1 %1573 }
 0x18b   : > { %v1576_v9 = vunpack.i.h.bf16 %v1574_v34  ;;  %v1575_v12 = vunpack.i.l.bf16 %v1574_v34  ;;  %v617_v14 = vsel %vm616_vm11, %v1915_v2, %v1565_v57  ;;  %v755_v15 = vsel %vm616_vm11, %v1918_v3, %v1566_v55 }
 0x18c   : > { %v1569_v47 = vpop.permute.xlu0 %1568 }
 0x18d   : > { %v1571_v13 = vunpack.i.h.bf16 %v1569_v47  ;;  %v1570_v48 = vunpack.i.l.bf16 %v1569_v47 }
 0x18e   : > { %v647_v58 = vpop.permute.xlu1 %646 }
 0x18f   : > { %v697_v49 = vsel %vm616_vm11, %v1911_v0, %v647_v58  ;;  %vm549_vm11 = vcmask 982016  }
 0x190   : > { %v1579_v7 = vpop.permute.xlu0 %1578 }
 0x191   : > { %v1581_v10 = vunpack.i.h.bf16 %v1579_v7  ;;  %v1580_v11 = vunpack.i.l.bf16 %v1579_v7 }
 0x192   : > { %v1584_v16 = vpop.permute.xlu1 %1583 }
 0x193   : > { %v618_v17 = vsel %vm524_vm12, %v617_v14, %v1580_v11  ;;  %v756_v4 = vsel %vm524_vm12, %v755_v15, %v1581_v10  ;;  %v1586_v28 = vunpack.i.h.bf16 %v1584_v16  ;;  %v1585_v33 = vunpack.i.l.bf16 %v1584_v16 }
 0x194   : > { %v619_v23 = vsel %vm526_vm13, %v618_v17, %v1575_v12  ;;  %v757_v25 = vsel %vm526_vm13, %v756_v4, %v1576_v9  ;;  %v677_v2 = vpop.permute.xlu0 %676 }
 0x195   : > { %v620_v34 = vsel %vm528_vm14, %v619_v23, %v1535_v53  ;;  %v758_v3 = vsel %vm528_vm14, %v757_v25, %v1536_v52  ;;  %v698_v55 = vsel %vm524_vm12, %v697_v49, %v1586_v28  ;;  %v525_v57 = vsel %vm524_vm12, 0.0, %v1585_v33 }
 0x196   : > { %v699_v7 = vsel %vm526_vm13, %v698_v55, %v1571_v13  ;;  %v527_v47 = vsel %vm526_vm13, %v525_v57, %v1570_v48  ;;  %v621_v0 = vsel %vm530_vm15, %v620_v34, %v1550_v63  ;;  %v759_v58 = vsel %vm530_vm15, %v758_v3, %v1551_v62  ;;  %v1589_v10 = vpop.permute.xlu1 %1588 }
 0x197   : > { %v700_v9 = vsel %vm528_vm14, %v699_v7, %v1995_v22  ;;  %v529_v53 = vsel %vm528_vm14, %v527_v47, 0.0  ;;  %v622_v52 = vsel %vm532_vm1, %v621_v0, %v1545_v61  ;;  %v760_v11 = vsel %vm532_vm1, %v759_v58, %v1546_v60 }
 0x198   : > { %v531_v12 = vsel %vm530_vm15, %v529_v53, 0.0  ;;  %v623_v13 = vsel %vm534_vm2, %v622_v52, %v1555_v5  ;;  %v701_v63 = vsel %vm530_vm15, %v700_v9, %v2001_v24  ;;  %v1591_v14 = vunpack.i.h.bf16 %v1589_v10  ;;  %v1594_v62 = vpop.permute.xlu0 %1593  ;;  %v1074_v9 = vld [vmem:[%s2335_s5 + $0x88] sm:$0xff]  ;;  %v1057_v53 = vld [vmem:[%s2335_s5] sm:$0xff] }
 0x199   : > { %v533_v15 = vsel %vm532_vm1, %v531_v12, %v1540_v59  ;;  %v624_v22 = vsel %vm302_vm0, %v623_v13, %v1520_v41  ;;  %v702_v61 = vsel %vm532_vm1, %v701_v63, %v1541_v54  ;;  %v1590_v60 = vunpack.i.l.bf16 %v1589_v10  ;;  %v1073_v10 = vld [vmem:[%s2335_s5 + $0x80] sm:$0xff]  ;;  %v1075_v63 = vld [vmem:[%s2335_s5 + $0x90] sm:$0xff] }
 0x19a   : > { %v535_v16 = vsel %vm534_vm2, %v533_v15, %v1560_v8  ;;  %v625_v5 = vsel %vm537_vm5, %v624_v22, %v1510_v38  ;;  %v703_v24 = vsel %vm534_vm2, %v702_v61, %v1561_v6  ;;  %v1596_v17 = vunpack.i.h.bf16 %v1594_v62  ;;  %v681_v4 = vpop.permute.xlu1 %680 }
 0x19b   : > { %v536_v59 = vsel %vm302_vm0, %v535_v16, %v1525_v36  ;;  %v704_v41 = vsel %vm302_vm0, %v703_v24, %v1526_v46  ;;  %v1595_v54 = vunpack.i.l.bf16 %v1594_v62  ;;  %v626_v8 = vsel %vm539_vm6, %v625_v5, %v1530_v51  ;;  %v1059_v62 = vld [vmem:[%s2335_s5 + $0x10] sm:$0xff] }
 0x19c   : > { %v538_v38 = vsel %vm537_vm5, %v536_v59, %v1505_v35  ;;  %v705_v6 = vsel %vm537_vm5, %v704_v41, %v1506_v32  ;;  %v627_v36 = vsel %vm541_vm7, %v626_v8, %v1515_v45  ;;  %v761_v39 = vsel %vm534_vm2, %v760_v11, %v1556_v1  ;;  %v1599_v46 = vpop.permute.xlu0 %1598  ;;  %v1058_v11 = vld [vmem:[%s2335_s5 + $0x8] sm:$0xff] }
 0x19d   : > { %v706_v28 = vsel %vm539_vm6, %v705_v6, %v677_v2  ;;  %v540_v51 = vsel %vm539_vm6, %v538_v38, %v1531_v50  ;;  %v628_v56 = vsel %vm543_vm8, %v627_v36, %v1495_v27  ;;  %v762_v32 = vsel %vm302_vm0, %v761_v39, %v1521_v40 }
 0x19e   : > { %v542_v20 = vsel %vm541_vm7, %v540_v51, %v1516_v43  ;;  %v707_v35 = vsel %vm541_vm7, %v706_v28, %v681_v4  ;;  %v763_v44 = vsel %vm537_vm5, %v762_v32, %v1511_v37  ;;  %v1601_v45 = vunpack.i.h.bf16 %v1599_v46  ;;  %v1604_v50 = vpop.permute.xlu1 %1603 }
 0x19f   : > { %v708_v1 = vsel %vm543_vm8, %v707_v35, %v1591_v14  ;;  %v764_v27 = vsel %vm539_vm6, %v763_v44, 0.0  ;;  %v544_v19 = vsel %vm543_vm8, %v542_v20, %v1590_v60  ;;  %v1600_v33 = vunpack.i.l.bf16 %v1599_v46  ;;  %v1076_v14 = vld [vmem:[%s2335_s5 + $0x98] sm:$0xff] }
 0x1a0   : > { %v765_v40 = vsel %vm541_vm7, %v764_v27, 0.0  ;;  %v1606_v21 = vunpack.i.h.bf16 %v1604_v50  ;;  %v1605_v48 = vunpack.i.l.bf16 %v1604_v50  ;;  %v691_v43 = vpop.permute.xlu0 %690  ;;  %v709_v49 = vsel %vm545_vm9, %v708_v1, %v1601_v45  ;;  %v1060_v60 = vld [vmem:[%s2335_s5 + $0x18] sm:$0xff] }
 0x1a1   : > { %v766_v18 = vsel %vm543_vm8, %v765_v40, %v1496_v26  ;;  %v546_v37 = vsel %vm545_vm9, %v544_v19, %v1600_v33  ;;  %v710_v23 = vsel %vm547_vm10, %v709_v49, %v691_v43  ;;  %v629_v25 = vsel %vm545_vm9, %v628_v56, %v1500_v30  ;;  %v1077_v19 = vld [vmem:[%s2335_s5 + $0xa0] sm:$0xff]  ;;  %v1078_v33 = vld [vmem:[%s2335_s5 + $0xa8] sm:$0xff]  ;;  %v1079_v43 = vld [vmem:[%s2335_s5 + $0xb0] sm:$0xff] }
 0x1a2   : > { %v695_v2 = vpop.permute.xlu1 %694  ;;  %v767_v34 = vsel %vm545_vm9, %v766_v18, %v1501_v29  ;;  %v548_v3 = vsel %vm547_vm10, %v546_v37, %v1596_v17  ;;  %v630_v55 = vsel %vm547_vm10, %v629_v25, %v1595_v54  ;;  %vm776_vm13 = vcmask 1043456   ;;  %v1248_v29 = vld [vmem:[%s2334_s4] ss:$0 sm:$0xff]  ;;  %v1080_v49 = vld [vmem:[%s2335_s5 + $0xb8] sm:$0xff]  ;;  %v1063_v37 = vld [vmem:[%s2335_s5 + $0x30] sm:$0xff] }
 0x1a3   : > { %v768_v31 = vsel %vm547_vm10, %v767_v34, 0.0  ;;  %v550_v26 = vsel %vm549_vm11, %v548_v3, %v1606_v21  ;;  %v631_v57 = vsel %vm549_vm11, %v630_v55, %v1605_v48  ;;  %v711_v7 = vsel %vm549_vm11, %v710_v23, %v695_v2  ;;  %v1061_v40 = vld [vmem:[%s2335_s5 + $0x20] sm:$0xff]  ;;  %v1062_v48 = vld [vmem:[%s2335_s5 + $0x28] sm:$0xff]  ;;  %v1064_v23 = vld [vmem:[%s2335_s5 + $0x38] sm:$0xff] }
 0x1a4   : > { %v769_v30 = vsel %vm549_vm11, %v768_v31, 0.0  ;;  %v771_v47 = vrot.slane %v631_v57, 4  ;;  %v1437_v52 = vpack.c.bf16 %v1074_v9, %v1073_v10  ;;  %v1439_v13 = vpack.c.bf16 %v1058_v11, %v1057_v53  ;;  %v1081_v34 = vld [vmem:[%s2335_s5 + $0xc0] sm:$0xff]  ;;  %v1082_v3 = vld [vmem:[%s2335_s5 + $0xc8] sm:$0xff]  ;;  %v1068_v11 = vld [vmem:[%s2335_s5 + $0x58] sm:$0xff] }
 0x1a5   : > { %v774_v0 = vrot.slane %v769_v30, 4  ;;  %v1441_v61 = vpack.c.bf16 %v1076_v14, %v1075_v63  ;;  %v1443_v5 = vpack.c.bf16 %v1060_v60, %v1059_v62  ;;  %vm889_vm5 = vcmask 1041408   ;;  %v1066_v30 = vld [vmem:[%s2335_s5 + $0x48] sm:$0xff] }
 0x1a6   : > { %v777_v42 = vsel %vm776_vm13, %v550_v26, %v771_v47  ;;  %1438 = vmatprep.subr.bf16.mxu0 %v1437_v52  ;;  %v1445_v18 = vpack.c.bf16 %v1078_v33, %v1077_v19  ;;  %v1447_v25 = vpack.c.bf16 %v1062_v48, %v1061_v40  ;;  %v1449_v2 = vpack.c.bf16 %v1080_v49, %v1079_v43  ;;  %v1083_v47 = vld [vmem:[%s2335_s5 + $0xd0] sm:$0xff]  ;;  %v1070_v60 = vld [vmem:[%s2335_s5 + $0x68] sm:$0xff] }
 0x1a7   : > { %v778_v58 = vsel %vm776_vm13, %v711_v7, %v774_v0  ;;  %1386 = vmatprep.mubr.f32.mxu1 %v777_v42  ;;  %1440 = vmatpush3.bf16.msra.mxu0 %v1439_v13  ;;  %v1451_v55 = vpack.c.bf16 %v1064_v23, %v1063_v37  ;;  %v1453_v57 = vpack.c.bf16 %v1082_v3, %v1081_v34  ;;  %v1065_v7 = vld [vmem:[%s2335_s5 + $0x40] sm:$0xff]  ;;  %v1084_v0 = vld [vmem:[%s2335_s5 + $0xd8] sm:$0xff]  ;;  %v1067_v52 = vld [vmem:[%s2335_s5 + $0x50] sm:$0xff] }
 0x1a8   : > { %1387 = vmatmul.mubr.f32.vlgmr.msra.gmra.mrb[8].mxu1 %v778_v58  ;;  %1442 = vmatprep.subr.bf16.mxu0 %v1441_v61  ;;  %v1457_v53 = vpack.c.bf16 %v1084_v0, %v1083_v47  ;;  %v1086_v13 = vld [vmem:[%s2335_s5 + $0xe8] sm:$0xff]  ;;  %v1069_v61 = vld [vmem:[%s2335_s5 + $0x60] sm:$0xff] }
 0x1ab   : > { %1444 = vmatpush3.bf16.msra.mxu0 %v1443_v5  ;;  %v1087_v5 = vld [vmem:[%s2335_s5 + $0xf0] sm:$0xff] }
 0x1ac   : > { %1446 = vmatprep.subr.bf16.mxu0 %v1445_v18 }
 0x1af   : > { %1448 = vmatpush3.bf16.msra.mxu0 %v1447_v25 }
 0x1b0   : > { %1450 = vmatprep.subr.bf16.mxu0 %v1449_v2 }
 0x1b3   : > { %1452 = vmatpush3.bf16.msra.mxu0 %v1451_v55 }
 0x1b4   : > { %1454 = vmatprep.subr.bf16.mxu0 %v1453_v57 }
 0x27b   : > { %v1388_v12 = vpop.f32.mrb[8].mxu1 }
 0x27c   : > { %v874_v15 = vadd.f32 %v1388_v12, %v1248_v29  ;;  %v868_v22 = vpop.f32.mrb[9].mxu1  ;;  %v1085_v12 = vld [vmem:[%s2335_s5 + $0xe0] sm:$0xff] }
 0x27d   : > { %v869_v16 = vadd.f32 %v1248_v29, %v868_v22  ;;  %v1455_v29 = vpack.c.bf16 %v1066_v30, %v1065_v7  ;;  %v1461_v22 = vpack.c.bf16 %v1086_v13, %v1085_v12 }
 0x27e   : > { %vm878_vm15 = vcmp.gt.f32.partialorder %v874_v15, 0.0  ;;  %v880_v24 = vmul.f32 0.2, %v874_v15 }
 0x27f   : > { %vm877_vm2 = vcmp.gt.f32.partialorder %v869_v16, 0.0  ;;  %v879_v17 = vmul.f32 0.2, %v869_v16  ;;  %1456 = vmatpush3.bf16.msra.mxu0 %v1455_v29 }
 0x280   : > { %v2156_v4 = vsel %vm878_vm15, %v874_v15, %v880_v24  ;;  %v1459_v15 = vpack.c.bf16 %v1068_v11, %v1067_v52  ;;  %1458 = vmatprep.subr.bf16.mxu0 %v1457_v53  ;;  %v1088_v24 = vld [vmem:[%s2335_s5 + $0xf8] sm:$0xff] }
 0x281   : > { %v2158_v59 = vsel %vm877_vm2, %v869_v16, %v879_v17  ;;  %v938_v41 = vrot.slane %v2156_v4, 1  ;;  %v998_v54 = vrot.slane %v2156_v4, 4  ;;  %v1002_v8 = vrot.slane %v2156_v4, 5 }
 0x282   : > { %v1607_v38 = vpack.i.bf16 %v2158_v59, %v2156_v4  ;;  %v911_v6 = vrot.slane %v2158_v59, 1  ;;  %v919_v36 = vrot.slane %v2158_v59, 4  ;;  %v923_v39 = vrot.slane %v2158_v59, 5 }
 0x283   : > { %v887_v46 = vrot.slane %v2158_v59, 2  ;;  %v901_v28 = vrot.slane %v2156_v4, 2  ;;  %v894_v51 = vrot.slane %v2158_v59, 6  ;;  %v960_v20 = vrot.slane %v2156_v4, 6  ;;  %1460 = vmatpush3.bf16.msra.mxu0 %v1459_v15 }
 0x284   : > { %1608 = vrot.lane.b32.xlu0 %v1607_v38, %s1697_s26  ;;  %v2172_v56 = vpack.i.bf16 %v911_v6, %v938_v41  ;;  %v1632_v32 = vpack.i.bf16 %v919_v36, %v998_v54  ;;  %v1637_v35 = vpack.i.bf16 %v923_v39, %v1002_v8  ;;  %v891_v31 = vrot.slane %v2158_v59, 3  ;;  %1462 = vmatprep.subr.bf16.mxu0 %v1461_v22  ;;  %v1072_v41 = vld [vmem:[%s2335_s5 + $0x78] sm:$0xff] }
 0x285   : > { %v890_v44 = vsel %vm889_vm5, %v887_v46, 0.0  ;;  %v903_v45 = vsel %vm889_vm5, %v901_v28, 0.0  ;;  %v896_v1 = vsel %vm889_vm5, %v894_v51, 0.0  ;;  %v962_v27 = vsel %vm889_vm5, %v960_v20, 0.0 }
 0x286   : > { %1618 = vrot.lane.b32.xlu1 %v2172_v56, %s1691_s14  ;;  %v2179_v50 = vpack.i.bf16 %v890_v44, %v903_v45  ;;  %v1652_v21 = vpack.i.bf16 %v896_v1, %v962_v27  ;;  %v957_v26 = vrot.slane %v2156_v4, 3  ;;  %v884_v42 = vrot.slane %v2158_v59, 7  ;;  %v1071_v59 = vld [vmem:[%s2335_s5 + $0x70] sm:$0xff] }
 0x287   : > { %v898_v58 = vrot.slane %v2156_v4, 7  ;;  %v2235_v10 = vsel %vm459_vm4, 0.0, %v891_v31  ;;  %v1463_v17 = vpack.c.bf16 %v1070_v60, %v1069_v61  ;;  %v1465_v4 = vpack.c.bf16 %v1088_v24, %v1087_v5 }
 0x288   : > { %1613 = vrot.lane.b32.xlu0 %v1607_v38, %s1690_s9  ;;  %v959_v9 = vsel %vm459_vm4, 0.0, %v957_v26  ;;  %v886_v63 = vsel %vm459_vm4, 0.0, %v884_v42  ;;  %v1467_v54 = vpack.c.bf16 %v1072_v41, %v1071_v59 }
 0x289   : > { %v900_v14 = vsel %vm459_vm4, 0.0, %v898_v58  ;;  %v1647_v62 = vpack.i.bf16 %v2235_v10, %v959_v9  ;;  %1464 = vmatpush3.bf16.msra.mxu0 %v1463_v17  ;;  %vm1171_vm4 = vcmask 48128  }
 0x28a   : > { %1633 = vrot.lane.b32.xlu1 %v1632_v32, %s1690_s9  ;;  %v1657_v16 = vpack.i.bf16 %v886_v63, %v900_v14  ;;  %1466 = vmatprep.subr.bf16.mxu0 %v1465_v4 }
 0x28c   : > { %1623 = vrot.lane.b32.xlu0 %v1632_v32, %s1697_s26 }
 0x28d   : > { %1468 = vmatpush3.bf16.msra.mxu0 %v1467_v54 }
 0x28e   : > { %1638 = vrot.lane.b32.xlu1 %v1637_v35, %s1685_s27 }
 0x290   : > { %1628 = vrot.lane.b32.xlu0 %v1637_v35, %s1691_s14 }
 0x292   : > { %1643 = vrot.lane.b32.xlu1 %v2179_v50, %s1692_s15 }
 0x294   : > { %1653 = vrot.lane.b32.xlu0 %v1652_v21, %s1692_s15 }
 0x296   : > { %1648 = vrot.lane.b32.xlu1 %v1647_v62, %s1688_s30 }
 0x298   : > { %1658 = vrot.lane.b32.xlu0 %v1657_v16, %s1688_s30 }
 0x29a   : > { %1663 = vrot.lane.b32.xlu1 %v1652_v21, %s1698_s21 }
 0x29c   : > { %1668 = vrot.lane.b32.xlu0 %v2172_v56, %s1685_s27  ;;  %s1253_s27 = sshll.u32 %s2339_s25, 4 }
 0x29d   : > { %s278_s14 = scalar_lea.vmem %s2337_s7, %s1253_s27 }
 0x29e   : > { %1673 = vrot.lane.b32.xlu1 %v2179_v50, %s1698_s21 }
 0x2f6   : > { %v1609_v8 = vpop.permute.xlu0 %1608 }
 0x2f7   : > { %v1611_v39 = vunpack.i.h.bf16 %v1609_v8  ;;  %v1610_v28 = vunpack.i.l.bf16 %v1609_v8 }
 0x2f8   : > { %v1619_v38 = vpop.permute.xlu1 %1618 }
 0x2f9   : > { %v1621_v32 = vunpack.i.h.bf16 %v1619_v38  ;;  %v1010_v20 = vsel %vm524_vm12, %v886_v63, %v1611_v39  ;;  %v1620_v56 = vunpack.i.l.bf16 %v1619_v38  ;;  %v1017_v44 = vsel %vm524_vm12, %v900_v14, %v1610_v28 }
 0x2fa   : > { %v2281_v6 = vpop.permute.xlu0 %1613 }
 0x2fb   : > { %v1011_v19 = vsel %vm528_vm14, %v1010_v20, %v1621_v32  ;;  %v1018_v33 = vsel %vm528_vm14, %v1017_v44, %v1620_v56  ;;  %v1616_v61 = vunpack.i.h.bf16 %v2281_v6  ;;  %v1615_v60 = vunpack.i.l.bf16 %v2281_v6 }
 0x2fc   : > { %v1634_v36 = vpop.permute.xlu1 %1633 }
 0x2fd   : > { %v1636_v49 = vunpack.i.h.bf16 %v1634_v36  ;;  %v1635_v18 = vunpack.i.l.bf16 %v1634_v36 }
 0x2fe   : > { %v1624_v46 = vpop.permute.xlu0 %1623 }
 0x2ff   : > { %v1625_v45 = vunpack.i.l.bf16 %v1624_v46  ;;  %v1626_v1 = vunpack.i.h.bf16 %v1624_v46 }
 0x300   : > { %v1639_v51 = vpop.permute.xlu1 %1638 }
 0x301   : > { %v1033_v37 = vsel %vm524_vm12, %v959_v9, %v1625_v45  ;;  %v950_v25 = vsel %vm524_vm12, %v2235_v10, %v1626_v1  ;;  %v1641_v2 = vunpack.i.h.bf16 %v1639_v51  ;;  %v1640_v31 = vunpack.i.l.bf16 %v1639_v51 }
 0x302   : > { %v1629_v35 = vpop.permute.xlu0 %1628 }
 0x303   : > { %v1630_v50 = vunpack.i.l.bf16 %v1629_v35  ;;  %v1631_v40 = vunpack.i.h.bf16 %v1629_v35 }
 0x304   : > { %v1644_v27 = vpop.permute.xlu1 %1643 }
 0x305   : > { %v1646_v21 = vunpack.i.h.bf16 %v1644_v27  ;;  %v1645_v48 = vunpack.i.l.bf16 %v1644_v27  ;;  %v1034_v34 = vsel %vm528_vm14, %v1033_v37, %v1630_v50  ;;  %v951_v30 = vsel %vm528_vm14, %v950_v25, %v1631_v40  ;;  %v1249_v40 = vld [vmem:[%s2336_s6] ss:$0 sm:$0xff] }
 0x306   : > { %v1654_v43 = vpop.permute.xlu0 %1653 }
 0x307   : > { %v1655_v23 = vunpack.i.l.bf16 %v1654_v43  ;;  %v1656_v3 = vunpack.i.h.bf16 %v1654_v43  ;;  %v1012_v47 = vsel %vm532_vm1, %v1011_v19, %v1646_v21  ;;  %v1019_v0 = vsel %vm532_vm1, %v1018_v33, %v1645_v48 }
 0x308   : > { %v1649_v55 = vpop.permute.xlu1 %1648 }
 0x309   : > { %v1035_v26 = vsel %vm532_vm1, %v1034_v34, %v1655_v23  ;;  %v1651_v57 = vunpack.i.h.bf16 %v1649_v55  ;;  %v1650_v7 = vunpack.i.l.bf16 %v1649_v55  ;;  %v952_v52 = vsel %vm532_vm1, %v951_v30, %v1656_v3 }
 0x30a   : > { %v1036_v42 = vsel %vm302_vm0, %v1035_v26, 0.0  ;;  %v1659_v58 = vpop.permute.xlu0 %1658 }
 0x30b   : > { %v1013_v29 = vsel %vm302_vm0, %v1012_v47, %v1651_v57  ;;  %v1020_v10 = vsel %vm302_vm0, %v1019_v0, %v1650_v7  ;;  %v1661_v9 = vunpack.i.h.bf16 %v1659_v58  ;;  %v1660_v53 = vunpack.i.l.bf16 %v1659_v58 }
 0x30c   : > { %v1014_v11 = vsel %vm539_vm6, %v1013_v29, %v1636_v49  ;;  %v1021_v12 = vsel %vm539_vm6, %v1020_v10, %v1635_v18  ;;  %v1664_v13 = vpop.permute.xlu1 %1663  ;;  %v1037_v63 = vsel %vm539_vm6, %v1036_v42, 0.0 }
 0x30d   : > { %v946_v14 = vsel %vm302_vm0, 0.0, %v1661_v9  ;;  %v953_v62 = vsel %vm302_vm0, %v952_v52, %v1660_v53  ;;  %v1666_v15 = vunpack.i.h.bf16 %v1664_v13  ;;  %v1665_v22 = vunpack.i.l.bf16 %v1664_v13 }
 0x30e   : > { %v1015_v16 = vsel %vm543_vm8, %v1014_v11, %v1641_v2  ;;  %v1022_v5 = vsel %vm543_vm8, %v1021_v12, %v1640_v31  ;;  %v1669_v24 = vpop.permute.xlu0 %1668  ;;  %v947_v54 = vsel %vm539_vm6, %v946_v14, %v1616_v61  ;;  %v954_v8 = vsel %vm539_vm6, %v953_v62, %v1615_v60 }
 0x30f   : > { %v1016_v17 = vsel %vm547_vm10, %v1015_v16, %v1666_v15  ;;  %v1023_v4 = vsel %vm547_vm10, %v1022_v5, %v1665_v22  ;;  %v1671_v59 = vunpack.i.h.bf16 %v1669_v24  ;;  %v1670_v41 = vunpack.i.l.bf16 %v1669_v24 }
 0x310   : > { %v1674_v38 = vpop.permute.xlu1 %1673  ;;  %v1038_v36 = vsel %vm543_vm8, %v1037_v63, 0.0  ;;  %v1042_v51 = vrot.slane %v1016_v17, 5  ;;  %v1043_v20 = vrot.slane %v1023_v4, 5  ;;  %vm1054_vm0 = vcmask 1045504  }
 0x311   : > { %v948_v6 = vsel %vm543_vm8, %v947_v54, %v1671_v59  ;;  %v955_v39 = vsel %vm543_vm8, %v954_v8, %v1670_v41  ;;  %v1676_v46 = vunpack.i.h.bf16 %v1674_v38  ;;  %v1675_v28 = vunpack.i.l.bf16 %v1674_v38 }
 0x312   : > { %v1039_v32 = vsel %vm547_vm10, %v1038_v36, 0.0 }
 0x313   : > { %v949_v56 = vsel %vm547_vm10, %v948_v6, %v1676_v46  ;;  %v956_v35 = vsel %vm547_vm10, %v955_v39, %v1675_v28  ;;  %v1049_v44 = vrot.slane %v1039_v32, 2 }
 0x314   : > { %v1048_v45 = vrot.slane %v956_v35, 2  ;;  %v1053_v1 = vsel %vm464_vm3, %v956_v35, %v1043_v20  ;;  %v1052_v50 = vsel %vm464_vm3, %v949_v56, %v1042_v51  ;;  %vm1173_vm3 = vcmask 40960  }
 0x315   : > { %v1056_v27 = vsel %vm1054_vm0, %v1053_v1, %v1049_v44 }
 0x316   : > { %1160 = vmatprep.mubr.f32.mxu0 %v1056_v27  ;;  %v1055_v19 = vsel %vm1054_vm0, %v1052_v50, %v1048_v45 }
 0x317   : > { %1161 = vmatmul.mubr.f32.vlgmr.msra.gmra.mrb[0].mxu0 %v1055_v19 }
 0x318   : > { %1165 = vmatprep.mubr.f32.mxu0 %v1049_v44 }
 0x31b   : > { %1166 = vmatmul.mubr.f32.gmra.mrb[2].mxu0 %v1048_v45 }
 0x3ea   : > { %v1320_v33 = vpop.f32.mrb[0].mxu0 }
 0x3eb   : > { %v1321_v21 = vpop.f32.mrb[1].mxu0 }
 0x3ec   : > { %v1322_v48 = vadd.f32 %v1321_v21, %v1320_v33 }
 0x3ee   : > { %v1163_v43 = vadd.f32 %v1322_v48, %v1249_v40  ;;  %v1323_v49 = vpop.f32.mrb[2].mxu0 }
 0x3ef   : > { %v1324_v18 = vpop.f32.mrb[3].mxu0 }
 0x3f0   : > { %1172 = vst.msk [vmem:[%s278_s14] sm:$0xff] %vm1171_vm4, %v1163_v43  ;;  %v1325_v37 = vadd.f32 %v1324_v18, %v1323_v49 }
 0x3f2   : > { %v1168_v23 = vadd.f32 %v1325_v37, %v1249_v40 }
 0x3f4   : > { %1174 = vst.msk [vmem:[%s278_s14 + $0x8] sm:$0x1] %vm1173_vm3, %v1168_v23 }
 0x3f5 PF: > { %s17_s24 = sadd.s32 1, %s1683_s24  }
 0x3f6   : > { %p14_p4 = scmp.ge.s32.totalorder %s17_s24, 4  }
 0x3f8   :  { %16 = sbr.rel (!%p14_p4) target bundleno = 1 (0x1), region = 78 }

</bundles_post_ra>
